<compile_context>
chip_gen: v5e
topology: v5e:2x2
jax: 0.10.0
libtpu: 0.0.40
codegen_flags: <defaults>
</compile_context>

<pallas_src>
import jax
import jax.numpy as jnp
from jax.experimental import pallas as pl
from jax.experimental.pallas import tpu as pltpu


# ----------------------------- model config ---------------------------------
VOCAB = 100
B = 2            # batch
S = 8            # sequence length
T = B * S        # tokens processed per call
H = 32           # hidden size
NH = 2           # attention heads
DH = H // NH     # head dim
F = 64           # FFN intermediate
NLAYERS = 2
NUM_LABELS = 5
L_PAD = 128      # lane-dense padded classifier width (sliced to NUM_LABELS outside)
LN_EPS = 1e-12
IGNORE = -100


# ------------------------------ Pallas kernel --------------------------------
def _layernorm(x, gamma, beta):
    mu = jnp.mean(x, axis=-1, keepdims=True)
    var = jnp.mean((x - mu) ** 2, axis=-1, keepdims=True)
    return (x - mu) * jax.lax.rsqrt(var + LN_EPS) * gamma + beta


def model_kernel(ids_ref,                                   # SMEM (B,S) int32 (scalar prefetch)
                 emb_ref, pos_ref, eg_ref, eb_ref,          # embeddings / emb-LN
                 wqkv_ref, bqkv_ref, wo_ref, bo_ref,        # attention (stacked over layers)
                 g1_ref, b1_ref,
                 w1_ref, bi1_ref, w2_ref, bi2_ref,          # FFN (stacked over layers)
                 g2_ref, b2_ref,
                 wc_ref, bc_ref,                            # classifier (pre-padded to L_PAD)
                 labels_ref,                                # (T,1) int32
                 logits_ref, loss_ref,                      # outputs
                 xs_ref):                                   # VMEM scratch (T,H)
    """Single grid step: embedding gather -> emb LN -> NLAYERS encoder layers
    (statically unrolled) -> classifier -> masked CE loss."""

    # --- embedding gather + position add (static unroll over T tokens) -------
    for t in range(T):
        b, s = divmod(t, S)
        idx = ids_ref[b, s]                                  # SMEM scalar
        xs_ref[pl.ds(t, 1), :] = emb_ref[idx] + pos_ref[pl.ds(s, 1), :]
    # TODO(synk): token-type embeddings, attention_mask and dropout are omitted
    # (eval-mode, full-length sequences only).

    x = _layernorm(xs_ref[...], eg_ref[...], eb_ref[...])    # (T, H)

    scale = 1.0 / float(DH) ** 0.5
    # --- encoder layers: static unroll, weights read from stacked refs -------
    for l in range(NLAYERS):
        # fused QKV projection: one (T,H)@(H,3H) MXU push
        qkv = jnp.dot(x, wqkv_ref[l],
                      preferred_element_type=jnp.float32) + bqkv_ref[l]   # (T, 3H)
        q3 = qkv[:, 0 * H:1 * H].reshape(B, S, H)
        k3 = qkv[:, 1 * H:2 * H].reshape(B, S, H)
        v3 = qkv[:, 2 * H:3 * H].reshape(B, S, H)

        wo_l = wo_ref[l]                                      # (H, H)
        attn = bo_ref[l]                                      # (1, H), broadcasts
        for h in range(NH):                                   # NH = 2, static
            lo = h * DH
            qh = q3[:, :, lo:lo + DH]                         # (B, S, DH)
            kh = k3[:, :, lo:lo + DH]
            vh = v3[:, :, lo:lo + DH]
            sc = jnp.einsum('bqd,bkd->bqk', qh, kh,
                            preferred_element_type=jnp.float32) * scale
            sc = sc - jnp.max(sc, axis=-1, keepdims=True)
            p = jnp.exp(sc)
            p = p / jnp.sum(p, axis=-1, keepdims=True)        # exact softmax
            ctx = jnp.einsum('bqk,bkd->bqd', p, vh,
                             preferred_element_type=jnp.float32)           # (B,S,DH)
            # per-head context folded into the output projection, accumulated
            attn = attn + jnp.dot(ctx.reshape(T, DH), wo_l[lo:lo + DH, :],
                                  preferred_element_type=jnp.float32)      # (T, H)

        x = _layernorm(x + attn, g1_ref[l], b1_ref[l])

        hdn = jnp.dot(x, w1_ref[l],
                      preferred_element_type=jnp.float32) + bi1_ref[l]     # (T, F)
        # TODO(synk): tanh-approx GELU (HF BERT uses exact erf GELU, ~1e-3 diff).
        hdn = jax.nn.gelu(hdn, approximate=True)
        ffn = jnp.dot(hdn, w2_ref[l],
                      preferred_element_type=jnp.float32) + bi2_ref[l]     # (T, H)
        x = _layernorm(x + ffn, g2_ref[l], b2_ref[l])

    # --- classifier head: lane-dense (T, 128) store ---------------------------
    logits = jnp.dot(x, wc_ref[...],
                     preferred_element_type=jnp.float32) + bc_ref[...]     # (T, L_PAD)
    logits_ref[...] = logits

    # --- masked cross-entropy (ignore_index = -100), in-kernel ----------------
    lbl = labels_ref[...]                                     # (T, 1) int32
    valid = (lbl != IGNORE).astype(jnp.float32)               # (T, 1)
    lane = jax.lax.broadcasted_iota(jnp.int32, (T, L_PAD), 1)
    lane_ok = lane < NUM_LABELS
    lg = jnp.where(lane_ok, logits, -1e30)
    m = jnp.max(lg, axis=-1, keepdims=True)
    z = jnp.sum(jnp.where(lane_ok, jnp.exp(lg - m), 0.0), axis=-1, keepdims=True)
    logz = m + jnp.log(z)                                     # (T, 1)
    picked = jnp.sum(jnp.where(lane == lbl, logits, 0.0), axis=-1, keepdims=True)
    nll = (logz - picked) * valid
    denom = jnp.maximum(jnp.sum(valid, keepdims=True), 1.0)
    loss_ref[...] = jnp.sum(nll, keepdims=True) / denom


# ------------------------------ wrapper ---------------------------------------
LAYER_INPUT_KEYS = ('wqkv', 'bqkv', 'wo', 'bo', 'ln1_g', 'ln1_b',
                    'w1', 'b1', 'w2', 'b2', 'ln2_g', 'ln2_b')


def _zero_map(ndim):
    zeros = (0,) * ndim
    return lambda i, ids: zeros          # (grid idx, scalar-prefetch ref)


def run_model(params, input_ids, labels2d):
    """Runs the whole model in one pallas_call.  Returns padded logits
    (T, L_PAD) and a (1,1) loss."""
    layer_arrays = [params['layers'][k] for k in LAYER_INPUT_KEYS]
    tensor_inputs = ([params['tok_emb'], params['pos_emb'],
                      params['emb_ln_g'], params['emb_ln_b']]
                     + layer_arrays
                     + [params['cls_w_pad'], params['cls_b_pad'], labels2d])

    grid_spec = pltpu.PrefetchScalarGridSpec(
        num_scalar_prefetch=1,                      # input_ids -> SMEM
        grid=(1,),                                  # single step: no layer pipelining
        in_specs=[pl.BlockSpec(a.shape, _zero_map(a.ndim)) for a in tensor_inputs],
        out_specs=[pl.BlockSpec((T, L_PAD), _zero_map(2)),
                   pl.BlockSpec((1, 1), _zero_map(2))],
        scratch_shapes=[pltpu.VMEM((T, H), jnp.float32)],
    )

    return pl.pallas_call(
        model_kernel,
        out_shape=(jax.ShapeDtypeStruct((T, L_PAD), jnp.float32),
                   jax.ShapeDtypeStruct((1, 1), jnp.float32)),
        grid_spec=grid_spec,
        compiler_params=pltpu.CompilerParams(
            dimension_semantics=("arbitrary",)),    # serial tiny work; no megacore
    )(input_ids, *tensor_inputs)


# ------------------------------ parameters ------------------------------------
def init_params(key):
    keys = iter(jax.random.split(key, 16))
    std = 0.02
    rnd = lambda shape: jax.random.normal(next(keys), shape, jnp.float32) * std

    layers = {
        # Q|K|V fused at init: one (H, 3H) weight and (1, 3H) bias per layer.
        'wqkv': rnd((NLAYERS, H, 3 * H)),
        'bqkv': jnp.zeros((NLAYERS, 1, 3 * H), jnp.float32),
        'wo': rnd((NLAYERS, H, H)), 'bo': jnp.zeros((NLAYERS, 1, H), jnp.float32),
        'ln1_g': jnp.ones((NLAYERS, 1, H), jnp.float32),
        'ln1_b': jnp.zeros((NLAYERS, 1, H), jnp.float32),
        'w1': rnd((NLAYERS, H, F)), 'b1': jnp.zeros((NLAYERS, 1, F), jnp.float32),
        'w2': rnd((NLAYERS, F, H)), 'b2': jnp.zeros((NLAYERS, 1, H), jnp.float32),
        'ln2_g': jnp.ones((NLAYERS, 1, H), jnp.float32),
        'ln2_b': jnp.zeros((NLAYERS, 1, H), jnp.float32),
    }
    cls_w = rnd((H, NUM_LABELS))
    cls_b = jnp.zeros((1, NUM_LABELS), jnp.float32)
    return {
        # (VOCAB, 1, H): leading vocab axis so the in-kernel gather is a
        # dynamic leading-dim load of a (1, H) row.
        'tok_emb': rnd((VOCAB, 1, H)),
        'pos_emb': rnd((S, H)),
        'emb_ln_g': jnp.ones((1, H), jnp.float32),
        'emb_ln_b': jnp.zeros((1, H), jnp.float32),
        'layers': layers,
        # Classifier pre-padded to the lane-dense width at init (hoisted out
        # of the per-call path); padded columns stay exactly zero.
        'cls_w_pad': jnp.pad(cls_w, ((0, 0), (0, L_PAD - NUM_LABELS))),
        'cls_b_pad': jnp.pad(cls_b, ((0, 0), (0, L_PAD - NUM_LABELS))),
    }


# ------------------------------ forward ---------------------------------------
def forward(params, input_ids, labels=None):
    """Mirrors AutoModelForTokenClassification forward -> (loss, logits)."""
    if labels is None:
        labels2d = jnp.full((T, 1), IGNORE, jnp.int32)
    else:
        labels2d = labels.reshape(T, 1).astype(jnp.int32)

    logits_pad, loss2d = run_model(params, input_ids.astype(jnp.int32), labels2d)
    logits = logits_pad[:, :NUM_LABELS].reshape(B, S, NUM_LABELS)
    loss = loss2d[0, 0] if labels is not None else None
    return {'loss': loss, 'logits': logits}


# ------------------------------ main -------------------------------------------
if __name__ == "__main__":
    key = jax.random.PRNGKey(0)
    pkey, ikey, lkey = jax.random.split(key, 3)

    params = init_params(pkey)
    input_ids = jax.random.randint(ikey, (B, S), 0, VOCAB, dtype=jnp.int32)
    labels = jax.random.randint(lkey, (B, S), 0, NUM_LABELS, dtype=jnp.int32)
    # mark some positions as ignored, like subtoken labels in the PyTorch module
    labels = labels.at[:, 0].set(IGNORE)

    fwd = jax.jit(forward)
    out = fwd(params, input_ids, labels)
    jax.block_until_ready(out['logits'])
    jax.block_until_ready(out['loss'])

    assert out['logits'].shape == (B, S, NUM_LABELS)
    assert bool(jnp.isfinite(out['loss']))
    print("KERNEL_OK")
</pallas_src>

<mosaic_0001>
module attributes {stable_mosaic.version = 11 : i64} {
  func.func @model_kernel(%arg0: i32, %arg1: memref<2x8xi32, #tpu.memory_space<smem>>, %arg2: memref<100x1x32xf32, #tpu.memory_space<vmem>>, %arg3: memref<8x32xf32, #tpu.memory_space<vmem>>, %arg4: memref<1x32xf32, #tpu.memory_space<vmem>>, %arg5: memref<1x32xf32, #tpu.memory_space<vmem>>, %arg6: memref<2x32x96xf32, #tpu.memory_space<vmem>>, %arg7: memref<2x1x96xf32, #tpu.memory_space<vmem>>, %arg8: memref<2x32x32xf32, #tpu.memory_space<vmem>>, %arg9: memref<2x1x32xf32, #tpu.memory_space<vmem>>, %arg10: memref<2x1x32xf32, #tpu.memory_space<vmem>>, %arg11: memref<2x1x32xf32, #tpu.memory_space<vmem>>, %arg12: memref<2x32x64xf32, #tpu.memory_space<vmem>>, %arg13: memref<2x1x64xf32, #tpu.memory_space<vmem>>, %arg14: memref<2x64x32xf32, #tpu.memory_space<vmem>>, %arg15: memref<2x1x32xf32, #tpu.memory_space<vmem>>, %arg16: memref<2x1x32xf32, #tpu.memory_space<vmem>>, %arg17: memref<2x1x32xf32, #tpu.memory_space<vmem>>, %arg18: memref<32x128xf32, #tpu.memory_space<vmem>>, %arg19: memref<1x128xf32, #tpu.memory_space<vmem>>, %arg20: memref<16x1xi32, #tpu.memory_space<vmem>>, %arg21: memref<16x128xf32, #tpu.memory_space<vmem>>, %arg22: memref<1x1xf32, #tpu.memory_space<vmem>>, %arg23: memref<16x32xf32, #tpu.memory_space<vmem>>) attributes {dimension_semantics = [#tpu.dimension_semantics<arbitrary>], iteration_bounds = array<i64: 1>, scalar_prefetch = 1 : i64, scratch_operands = 1 : i64, tpu.core_type = #tpu.core_type<tc>, window_params = [{pipeline_mode = #tpu.pipeline_mode<synchronous>, transform_indices = @transform_0, window_bounds = array<i64: 100, 1, 32>}, {pipeline_mode = #tpu.pipeline_mode<synchronous>, transform_indices = @transform_1, window_bounds = array<i64: 8, 32>}, {pipeline_mode = #tpu.pipeline_mode<synchronous>, transform_indices = @transform_2, window_bounds = array<i64: 1, 32>}, {pipeline_mode = #tpu.pipeline_mode<synchronous>, transform_indices = @transform_3, window_bounds = array<i64: 1, 32>}, {pipeline_mode = #tpu.pipeline_mode<synchronous>, transform_indices = @transform_4, window_bounds = array<i64: 2, 32, 96>}, {pipeline_mode = #tpu.pipeline_mode<synchronous>, transform_indices = @transform_5, window_bounds = array<i64: 2, 1, 96>}, {pipeline_mode = #tpu.pipeline_mode<synchronous>, transform_indices = @transform_6, window_bounds = array<i64: 2, 32, 32>}, {pipeline_mode = #tpu.pipeline_mode<synchronous>, transform_indices = @transform_7, window_bounds = array<i64: 2, 1, 32>}, {pipeline_mode = #tpu.pipeline_mode<synchronous>, transform_indices = @transform_8, window_bounds = array<i64: 2, 1, 32>}, {pipeline_mode = #tpu.pipeline_mode<synchronous>, transform_indices = @transform_9, window_bounds = array<i64: 2, 1, 32>}, {pipeline_mode = #tpu.pipeline_mode<synchronous>, transform_indices = @transform_10, window_bounds = array<i64: 2, 32, 64>}, {pipeline_mode = #tpu.pipeline_mode<synchronous>, transform_indices = @transform_11, window_bounds = array<i64: 2, 1, 64>}, {pipeline_mode = #tpu.pipeline_mode<synchronous>, transform_indices = @transform_12, window_bounds = array<i64: 2, 64, 32>}, {pipeline_mode = #tpu.pipeline_mode<synchronous>, transform_indices = @transform_13, window_bounds = array<i64: 2, 1, 32>}, {pipeline_mode = #tpu.pipeline_mode<synchronous>, transform_indices = @transform_14, window_bounds = array<i64: 2, 1, 32>}, {pipeline_mode = #tpu.pipeline_mode<synchronous>, transform_indices = @transform_15, window_bounds = array<i64: 2, 1, 32>}, {pipeline_mode = #tpu.pipeline_mode<synchronous>, transform_indices = @transform_16, window_bounds = array<i64: 32, 128>}, {pipeline_mode = #tpu.pipeline_mode<synchronous>, transform_indices = @transform_17, window_bounds = array<i64: 1, 128>}, {pipeline_mode = #tpu.pipeline_mode<synchronous>, transform_indices = @transform_18, window_bounds = array<i64: 16, 1>}, {pipeline_mode = #tpu.pipeline_mode<synchronous>, transform_indices = @transform_19, window_bounds = array<i64: 16, 128>}, {pipeline_mode = #tpu.pipeline_mode<synchronous>, transform_indices = @transform_20, window_bounds = array<i64: 1, 1>}]} {
    %c0 = arith.constant 0 : index
    %c0_0 = arith.constant 0 : index
    %0 = memref.load %arg1[%c0, %c0_0] : memref<2x8xi32, #tpu.memory_space<smem>>
    %1 = arith.index_cast %0 : i32 to index
    %c0_1 = arith.constant 0 : index
    %c0_2 = arith.constant 0 : index
    %2 = vector.load %arg2[%1, %c0_1, %c0_2] : memref<100x1x32xf32, #tpu.memory_space<vmem>>, vector<1x1x32xf32>
    %3 = vector.shape_cast %2 : vector<1x1x32xf32> to vector<1x32xf32>
    %c0_3 = arith.constant 0 : index
    %c0_4 = arith.constant 0 : index
    %4 = vector.load %arg3[%c0_3, %c0_4] : memref<8x32xf32, #tpu.memory_space<vmem>>, vector<1x32xf32>
    %5 = arith.addf %3, %4 : vector<1x32xf32>
    %c0_5 = arith.constant 0 : index
    %c0_6 = arith.constant 0 : index
    %6 = vector.load %arg23[%c0_5, %c0_6] : memref<16x32xf32, #tpu.memory_space<vmem>>, vector<1x32xf32>
    tpu.vector_store %arg23[%c0_5, %c0_6], %5 {strides = array<i32>} : memref<16x32xf32, #tpu.memory_space<vmem>>, vector<1x32xf32>,
    %c0_7 = arith.constant 0 : index
    %c1 = arith.constant 1 : index
    %7 = memref.load %arg1[%c0_7, %c1] : memref<2x8xi32, #tpu.memory_space<smem>>
    %8 = arith.index_cast %7 : i32 to index
    %c0_8 = arith.constant 0 : index
    %c0_9 = arith.constant 0 : index
    %9 = vector.load %arg2[%8, %c0_8, %c0_9] : memref<100x1x32xf32, #tpu.memory_space<vmem>>, vector<1x1x32xf32>
    %10 = vector.shape_cast %9 : vector<1x1x32xf32> to vector<1x32xf32>
    %c1_10 = arith.constant 1 : index
    %c0_11 = arith.constant 0 : index
    %11 = vector.load %arg3[%c1_10, %c0_11] : memref<8x32xf32, #tpu.memory_space<vmem>>, vector<1x32xf32>
    %12 = arith.addf %10, %11 : vector<1x32xf32>
    %c1_12 = arith.constant 1 : index
    %c0_13 = arith.constant 0 : index
    %13 = vector.load %arg23[%c1_12, %c0_13] : memref<16x32xf32, #tpu.memory_space<vmem>>, vector<1x32xf32>
    tpu.vector_store %arg23[%c1_12, %c0_13], %12 {strides = array<i32>} : memref<16x32xf32, #tpu.memory_space<vmem>>, vector<1x32xf32>,
    %c0_14 = arith.constant 0 : index
    %c2 = arith.constant 2 : index
    %14 = memref.load %arg1[%c0_14, %c2] : memref<2x8xi32, #tpu.memory_space<smem>>
    %15 = arith.index_cast %14 : i32 to index
    %c0_15 = arith.constant 0 : index
    %c0_16 = arith.constant 0 : index
    %16 = vector.load %arg2[%15, %c0_15, %c0_16] : memref<100x1x32xf32, #tpu.memory_space<vmem>>, vector<1x1x32xf32>
    %17 = vector.shape_cast %16 : vector<1x1x32xf32> to vector<1x32xf32>
    %c2_17 = arith.constant 2 : index
    %c0_18 = arith.constant 0 : index
    %18 = vector.load %arg3[%c2_17, %c0_18] : memref<8x32xf32, #tpu.memory_space<vmem>>, vector<1x32xf32>
    %19 = arith.addf %17, %18 : vector<1x32xf32>
    %c2_19 = arith.constant 2 : index
    %c0_20 = arith.constant 0 : index
    %20 = vector.load %arg23[%c2_19, %c0_20] : memref<16x32xf32, #tpu.memory_space<vmem>>, vector<1x32xf32>
    tpu.vector_store %arg23[%c2_19, %c0_20], %19 {strides = array<i32>} : memref<16x32xf32, #tpu.memory_space<vmem>>, vector<1x32xf32>,
    %c0_21 = arith.constant 0 : index
    %c3 = arith.constant 3 : index
    %21 = memref.load %arg1[%c0_21, %c3] : memref<2x8xi32, #tpu.memory_space<smem>>
    %22 = arith.index_cast %21 : i32 to index
    %c0_22 = arith.constant 0 : index
    %c0_23 = arith.constant 0 : index
    %23 = vector.load %arg2[%22, %c0_22, %c0_23] : memref<100x1x32xf32, #tpu.memory_space<vmem>>, vector<1x1x32xf32>
    %24 = vector.shape_cast %23 : vector<1x1x32xf32> to vector<1x32xf32>
    %c3_24 = arith.constant 3 : index
    %c0_25 = arith.constant 0 : index
    %25 = vector.load %arg3[%c3_24, %c0_25] : memref<8x32xf32, #tpu.memory_space<vmem>>, vector<1x32xf32>
    %26 = arith.addf %24, %25 : vector<1x32xf32>
    %c3_26 = arith.constant 3 : index
    %c0_27 = arith.constant 0 : index
    %27 = vector.load %arg23[%c3_26, %c0_27] : memref<16x32xf32, #tpu.memory_space<vmem>>, vector<1x32xf32>
    tpu.vector_store %arg23[%c3_26, %c0_27], %26 {strides = array<i32>} : memref<16x32xf32, #tpu.memory_space<vmem>>, vector<1x32xf32>,
    %c0_28 = arith.constant 0 : index
    %c4 = arith.constant 4 : index
    %28 = memref.load %arg1[%c0_28, %c4] : memref<2x8xi32, #tpu.memory_space<smem>>
    %29 = arith.index_cast %28 : i32 to index
    %c0_29 = arith.constant 0 : index
    %c0_30 = arith.constant 0 : index
    %30 = vector.load %arg2[%29, %c0_29, %c0_30] : memref<100x1x32xf32, #tpu.memory_space<vmem>>, vector<1x1x32xf32>
    %31 = vector.shape_cast %30 : vector<1x1x32xf32> to vector<1x32xf32>
    %c4_31 = arith.constant 4 : index
    %c0_32 = arith.constant 0 : index
    %32 = vector.load %arg3[%c4_31, %c0_32] : memref<8x32xf32, #tpu.memory_space<vmem>>, vector<1x32xf32>
    %33 = arith.addf %31, %32 : vector<1x32xf32>
    %c4_33 = arith.constant 4 : index
    %c0_34 = arith.constant 0 : index
    %34 = vector.load %arg23[%c4_33, %c0_34] : memref<16x32xf32, #tpu.memory_space<vmem>>, vector<1x32xf32>
    tpu.vector_store %arg23[%c4_33, %c0_34], %33 {strides = array<i32>} : memref<16x32xf32, #tpu.memory_space<vmem>>, vector<1x32xf32>,
    %c0_35 = arith.constant 0 : index
    %c5 = arith.constant 5 : index
    %35 = memref.load %arg1[%c0_35, %c5] : memref<2x8xi32, #tpu.memory_space<smem>>
    %36 = arith.index_cast %35 : i32 to index
    %c0_36 = arith.constant 0 : index
    %c0_37 = arith.constant 0 : index
    %37 = vector.load %arg2[%36, %c0_36, %c0_37] : memref<100x1x32xf32, #tpu.memory_space<vmem>>, vector<1x1x32xf32>
    %38 = vector.shape_cast %37 : vector<1x1x32xf32> to vector<1x32xf32>
    %c5_38 = arith.constant 5 : index
    %c0_39 = arith.constant 0 : index
    %39 = vector.load %arg3[%c5_38, %c0_39] : memref<8x32xf32, #tpu.memory_space<vmem>>, vector<1x32xf32>
    %40 = arith.addf %38, %39 : vector<1x32xf32>
    %c5_40 = arith.constant 5 : index
    %c0_41 = arith.constant 0 : index
    %41 = vector.load %arg23[%c5_40, %c0_41] : memref<16x32xf32, #tpu.memory_space<vmem>>, vector<1x32xf32>
    tpu.vector_store %arg23[%c5_40, %c0_41], %40 {strides = array<i32>} : memref<16x32xf32, #tpu.memory_space<vmem>>, vector<1x32xf32>,
    %c0_42 = arith.constant 0 : index
    %c6 = arith.constant 6 : index
    %42 = memref.load %arg1[%c0_42, %c6] : memref<2x8xi32, #tpu.memory_space<smem>>
    %43 = arith.index_cast %42 : i32 to index
    %c0_43 = arith.constant 0 : index
    %c0_44 = arith.constant 0 : index
    %44 = vector.load %arg2[%43, %c0_43, %c0_44] : memref<100x1x32xf32, #tpu.memory_space<vmem>>, vector<1x1x32xf32>
    %45 = vector.shape_cast %44 : vector<1x1x32xf32> to vector<1x32xf32>
    %c6_45 = arith.constant 6 : index
    %c0_46 = arith.constant 0 : index
    %46 = vector.load %arg3[%c6_45, %c0_46] : memref<8x32xf32, #tpu.memory_space<vmem>>, vector<1x32xf32>
    %47 = arith.addf %45, %46 : vector<1x32xf32>
    %c6_47 = arith.constant 6 : index
    %c0_48 = arith.constant 0 : index
    %48 = vector.load %arg23[%c6_47, %c0_48] : memref<16x32xf32, #tpu.memory_space<vmem>>, vector<1x32xf32>
    tpu.vector_store %arg23[%c6_47, %c0_48], %47 {strides = array<i32>} : memref<16x32xf32, #tpu.memory_space<vmem>>, vector<1x32xf32>,
    %c0_49 = arith.constant 0 : index
    %c7 = arith.constant 7 : index
    %49 = memref.load %arg1[%c0_49, %c7] : memref<2x8xi32, #tpu.memory_space<smem>>
    %50 = arith.index_cast %49 : i32 to index
    %c0_50 = arith.constant 0 : index
    %c0_51 = arith.constant 0 : index
    %51 = vector.load %arg2[%50, %c0_50, %c0_51] : memref<100x1x32xf32, #tpu.memory_space<vmem>>, vector<1x1x32xf32>
    %52 = vector.shape_cast %51 : vector<1x1x32xf32> to vector<1x32xf32>
    %c7_52 = arith.constant 7 : index
    %c0_53 = arith.constant 0 : index
    %53 = vector.load %arg3[%c7_52, %c0_53] : memref<8x32xf32, #tpu.memory_space<vmem>>, vector<1x32xf32>
    %54 = arith.addf %52, %53 : vector<1x32xf32>
    %c7_54 = arith.constant 7 : index
    %c0_55 = arith.constant 0 : index
    %55 = vector.load %arg23[%c7_54, %c0_55] : memref<16x32xf32, #tpu.memory_space<vmem>>, vector<1x32xf32>
    tpu.vector_store %arg23[%c7_54, %c0_55], %54 {strides = array<i32>} : memref<16x32xf32, #tpu.memory_space<vmem>>, vector<1x32xf32>,
    %c1_56 = arith.constant 1 : index
    %c0_57 = arith.constant 0 : index
    %56 = memref.load %arg1[%c1_56, %c0_57] : memref<2x8xi32, #tpu.memory_space<smem>>
    %57 = arith.index_cast %56 : i32 to index
    %c0_58 = arith.constant 0 : index
    %c0_59 = arith.constant 0 : index
    %58 = vector.load %arg2[%57, %c0_58, %c0_59] : memref<100x1x32xf32, #tpu.memory_space<vmem>>, vector<1x1x32xf32>
    %59 = vector.shape_cast %58 : vector<1x1x32xf32> to vector<1x32xf32>
    %c0_60 = arith.constant 0 : index
    %c0_61 = arith.constant 0 : index
    %60 = vector.load %arg3[%c0_60, %c0_61] : memref<8x32xf32, #tpu.memory_space<vmem>>, vector<1x32xf32>
    %61 = arith.addf %59, %60 : vector<1x32xf32>
    %c8 = arith.constant 8 : index
    %c0_62 = arith.constant 0 : index
    %62 = vector.load %arg23[%c8, %c0_62] : memref<16x32xf32, #tpu.memory_space<vmem>>, vector<1x32xf32>
    tpu.vector_store %arg23[%c8, %c0_62], %61 {strides = array<i32>} : memref<16x32xf32, #tpu.memory_space<vmem>>, vector<1x32xf32>,
    %c1_63 = arith.constant 1 : index
    %c1_64 = arith.constant 1 : index
    %63 = memref.load %arg1[%c1_63, %c1_64] : memref<2x8xi32, #tpu.memory_space<smem>>
    %64 = arith.index_cast %63 : i32 to index
    %c0_65 = arith.constant 0 : index
    %c0_66 = arith.constant 0 : index
    %65 = vector.load %arg2[%64, %c0_65, %c0_66] : memref<100x1x32xf32, #tpu.memory_space<vmem>>, vector<1x1x32xf32>
    %66 = vector.shape_cast %65 : vector<1x1x32xf32> to vector<1x32xf32>
    %c1_67 = arith.constant 1 : index
    %c0_68 = arith.constant 0 : index
    %67 = vector.load %arg3[%c1_67, %c0_68] : memref<8x32xf32, #tpu.memory_space<vmem>>, vector<1x32xf32>
    %68 = arith.addf %66, %67 : vector<1x32xf32>
    %c9 = arith.constant 9 : index
    %c0_69 = arith.constant 0 : index
    %69 = vector.load %arg23[%c9, %c0_69] : memref<16x32xf32, #tpu.memory_space<vmem>>, vector<1x32xf32>
    tpu.vector_store %arg23[%c9, %c0_69], %68 {strides = array<i32>} : memref<16x32xf32, #tpu.memory_space<vmem>>, vector<1x32xf32>,
    %c1_70 = arith.constant 1 : index
    %c2_71 = arith.constant 2 : index
    %70 = memref.load %arg1[%c1_70, %c2_71] : memref<2x8xi32, #tpu.memory_space<smem>>
    %71 = arith.index_cast %70 : i32 to index
    %c0_72 = arith.constant 0 : index
    %c0_73 = arith.constant 0 : index
    %72 = vector.load %arg2[%71, %c0_72, %c0_73] : memref<100x1x32xf32, #tpu.memory_space<vmem>>, vector<1x1x32xf32>
    %73 = vector.shape_cast %72 : vector<1x1x32xf32> to vector<1x32xf32>
    %c2_74 = arith.constant 2 : index
    %c0_75 = arith.constant 0 : index
    %74 = vector.load %arg3[%c2_74, %c0_75] : memref<8x32xf32, #tpu.memory_space<vmem>>, vector<1x32xf32>
    %75 = arith.addf %73, %74 : vector<1x32xf32>
    %c10 = arith.constant 10 : index
    %c0_76 = arith.constant 0 : index
    %76 = vector.load %arg23[%c10, %c0_76] : memref<16x32xf32, #tpu.memory_space<vmem>>, vector<1x32xf32>
    tpu.vector_store %arg23[%c10, %c0_76], %75 {strides = array<i32>} : memref<16x32xf32, #tpu.memory_space<vmem>>, vector<1x32xf32>,
    %c1_77 = arith.constant 1 : index
    %c3_78 = arith.constant 3 : index
    %77 = memref.load %arg1[%c1_77, %c3_78] : memref<2x8xi32, #tpu.memory_space<smem>>
    %78 = arith.index_cast %77 : i32 to index
    %c0_79 = arith.constant 0 : index
    %c0_80 = arith.constant 0 : index
    %79 = vector.load %arg2[%78, %c0_79, %c0_80] : memref<100x1x32xf32, #tpu.memory_space<vmem>>, vector<1x1x32xf32>
    %80 = vector.shape_cast %79 : vector<1x1x32xf32> to vector<1x32xf32>
    %c3_81 = arith.constant 3 : index
    %c0_82 = arith.constant 0 : index
    %81 = vector.load %arg3[%c3_81, %c0_82] : memref<8x32xf32, #tpu.memory_space<vmem>>, vector<1x32xf32>
    %82 = arith.addf %80, %81 : vector<1x32xf32>
    %c11 = arith.constant 11 : index
    %c0_83 = arith.constant 0 : index
    %83 = vector.load %arg23[%c11, %c0_83] : memref<16x32xf32, #tpu.memory_space<vmem>>, vector<1x32xf32>
    tpu.vector_store %arg23[%c11, %c0_83], %82 {strides = array<i32>} : memref<16x32xf32, #tpu.memory_space<vmem>>, vector<1x32xf32>,
    %c1_84 = arith.constant 1 : index
    %c4_85 = arith.constant 4 : index
    %84 = memref.load %arg1[%c1_84, %c4_85] : memref<2x8xi32, #tpu.memory_space<smem>>
    %85 = arith.index_cast %84 : i32 to index
    %c0_86 = arith.constant 0 : index
    %c0_87 = arith.constant 0 : index
    %86 = vector.load %arg2[%85, %c0_86, %c0_87] : memref<100x1x32xf32, #tpu.memory_space<vmem>>, vector<1x1x32xf32>
    %87 = vector.shape_cast %86 : vector<1x1x32xf32> to vector<1x32xf32>
    %c4_88 = arith.constant 4 : index
    %c0_89 = arith.constant 0 : index
    %88 = vector.load %arg3[%c4_88, %c0_89] : memref<8x32xf32, #tpu.memory_space<vmem>>, vector<1x32xf32>
    %89 = arith.addf %87, %88 : vector<1x32xf32>
    %c12 = arith.constant 12 : index
    %c0_90 = arith.constant 0 : index
    %90 = vector.load %arg23[%c12, %c0_90] : memref<16x32xf32, #tpu.memory_space<vmem>>, vector<1x32xf32>
    tpu.vector_store %arg23[%c12, %c0_90], %89 {strides = array<i32>} : memref<16x32xf32, #tpu.memory_space<vmem>>, vector<1x32xf32>,
    %c1_91 = arith.constant 1 : index
    %c5_92 = arith.constant 5 : index
    %91 = memref.load %arg1[%c1_91, %c5_92] : memref<2x8xi32, #tpu.memory_space<smem>>
    %92 = arith.index_cast %91 : i32 to index
    %c0_93 = arith.constant 0 : index
    %c0_94 = arith.constant 0 : index
    %93 = vector.load %arg2[%92, %c0_93, %c0_94] : memref<100x1x32xf32, #tpu.memory_space<vmem>>, vector<1x1x32xf32>
    %94 = vector.shape_cast %93 : vector<1x1x32xf32> to vector<1x32xf32>
    %c5_95 = arith.constant 5 : index
    %c0_96 = arith.constant 0 : index
    %95 = vector.load %arg3[%c5_95, %c0_96] : memref<8x32xf32, #tpu.memory_space<vmem>>, vector<1x32xf32>
    %96 = arith.addf %94, %95 : vector<1x32xf32>
    %c13 = arith.constant 13 : index
    %c0_97 = arith.constant 0 : index
    %97 = vector.load %arg23[%c13, %c0_97] : memref<16x32xf32, #tpu.memory_space<vmem>>, vector<1x32xf32>
    tpu.vector_store %arg23[%c13, %c0_97], %96 {strides = array<i32>} : memref<16x32xf32, #tpu.memory_space<vmem>>, vector<1x32xf32>,
    %c1_98 = arith.constant 1 : index
    %c6_99 = arith.constant 6 : index
    %98 = memref.load %arg1[%c1_98, %c6_99] : memref<2x8xi32, #tpu.memory_space<smem>>
    %99 = arith.index_cast %98 : i32 to index
    %c0_100 = arith.constant 0 : index
    %c0_101 = arith.constant 0 : index
    %100 = vector.load %arg2[%99, %c0_100, %c0_101] : memref<100x1x32xf32, #tpu.memory_space<vmem>>, vector<1x1x32xf32>
    %101 = vector.shape_cast %100 : vector<1x1x32xf32> to vector<1x32xf32>
    %c6_102 = arith.constant 6 : index
    %c0_103 = arith.constant 0 : index
    %102 = vector.load %arg3[%c6_102, %c0_103] : memref<8x32xf32, #tpu.memory_space<vmem>>, vector<1x32xf32>
    %103 = arith.addf %101, %102 : vector<1x32xf32>
    %c14 = arith.constant 14 : index
    %c0_104 = arith.constant 0 : index
    %104 = vector.load %arg23[%c14, %c0_104] : memref<16x32xf32, #tpu.memory_space<vmem>>, vector<1x32xf32>
    tpu.vector_store %arg23[%c14, %c0_104], %103 {strides = array<i32>} : memref<16x32xf32, #tpu.memory_space<vmem>>, vector<1x32xf32>,
    %c1_105 = arith.constant 1 : index
    %c7_106 = arith.constant 7 : index
    %105 = memref.load %arg1[%c1_105, %c7_106] : memref<2x8xi32, #tpu.memory_space<smem>>
    %106 = arith.index_cast %105 : i32 to index
    %c0_107 = arith.constant 0 : index
    %c0_108 = arith.constant 0 : index
    %107 = vector.load %arg2[%106, %c0_107, %c0_108] : memref<100x1x32xf32, #tpu.memory_space<vmem>>, vector<1x1x32xf32>
    %108 = vector.shape_cast %107 : vector<1x1x32xf32> to vector<1x32xf32>
    %c7_109 = arith.constant 7 : index
    %c0_110 = arith.constant 0 : index
    %109 = vector.load %arg3[%c7_109, %c0_110] : memref<8x32xf32, #tpu.memory_space<vmem>>, vector<1x32xf32>
    %110 = arith.addf %108, %109 : vector<1x32xf32>
    %c15 = arith.constant 15 : index
    %c0_111 = arith.constant 0 : index
    %111 = vector.load %arg23[%c15, %c0_111] : memref<16x32xf32, #tpu.memory_space<vmem>>, vector<1x32xf32>
    tpu.vector_store %arg23[%c15, %c0_111], %110 {strides = array<i32>} : memref<16x32xf32, #tpu.memory_space<vmem>>, vector<1x32xf32>,
    %c0_112 = arith.constant 0 : index
    %c0_113 = arith.constant 0 : index
    %112 = vector.load %arg23[%c0_112, %c0_113] : memref<16x32xf32, #tpu.memory_space<vmem>>, vector<16x32xf32>
    %c0_114 = arith.constant 0 : index
    %c0_115 = arith.constant 0 : index
    %113 = vector.load %arg4[%c0_114, %c0_115] : memref<1x32xf32, #tpu.memory_space<vmem>>, vector<1x32xf32>
    %c0_116 = arith.constant 0 : index
    %c0_117 = arith.constant 0 : index
    %114 = vector.load %arg5[%c0_116, %c0_117] : memref<1x32xf32, #tpu.memory_space<vmem>>, vector<1x32xf32>
    %cst = arith.constant dense<0.000000e+00> : vector<16xf32>
    %115 = vector.multi_reduction <add>, %112, %cst [1] : vector<16x32xf32> to vector<16xf32>
    %116 = vector.shape_cast %115 : vector<16xf32> to vector<16x1xf32>
    %cst_118 = arith.constant 3.200000e+01 : f32
    %117 = vector.broadcast %cst_118 : f32 to vector<16x1xf32>
    %118 = arith.divf %116, %117 : vector<16x1xf32>
    %119 = vector.broadcast %118 : vector<16x1xf32> to vector<16x32xf32>
    %120 = arith.subf %112, %119 : vector<16x32xf32>
    %121 = arith.mulf %120, %120 : vector<16x32xf32>
    %cst_119 = arith.constant dense<0.000000e+00> : vector<16xf32>
    %122 = vector.multi_reduction <add>, %121, %cst_119 [1] : vector<16x32xf32> to vector<16xf32>
    %123 = vector.shape_cast %122 : vector<16xf32> to vector<16x1xf32>
    %cst_120 = arith.constant 3.200000e+01 : f32
    %124 = vector.broadcast %cst_120 : f32 to vector<16x1xf32>
    %125 = arith.divf %123, %124 : vector<16x1xf32>
    %126 = vector.broadcast %118 : vector<16x1xf32> to vector<16x32xf32>
    %127 = arith.subf %112, %126 : vector<16x32xf32>
    %cst_121 = arith.constant 9.99999996E-13 : f32
    %128 = vector.broadcast %cst_121 : f32 to vector<16x1xf32>
    %129 = arith.addf %125, %128 : vector<16x1xf32>
    %130 = math.rsqrt %129 : vector<16x1xf32>
    %131 = vector.broadcast %130 : vector<16x1xf32> to vector<16x32xf32>
    %132 = arith.mulf %127, %131 : vector<16x32xf32>
    %133 = vector.broadcast %113 : vector<1x32xf32> to vector<16x32xf32>
    %134 = arith.mulf %132, %133 : vector<16x32xf32>
    %135 = vector.broadcast %114 : vector<1x32xf32> to vector<16x32xf32>
    %136 = arith.addf %134, %135 : vector<16x32xf32>
    %c0_122 = arith.constant 0 : index
    %c0_123 = arith.constant 0 : index
    %c0_124 = arith.constant 0 : index
    %137 = vector.load %arg6[%c0_122, %c0_123, %c0_124] : memref<2x32x96xf32, #tpu.memory_space<vmem>>, vector<1x32x96xf32>
    %138 = vector.shape_cast %137 : vector<1x32x96xf32> to vector<32x96xf32>
    %cst_125 = arith.constant dense<0.000000e+00> : vector<16x96xf32>
    %139 = tpu.matmul %136, %138, %cst_125 {dimension_numbers = #tpu.dot_dimension_numbers<[1], [0], [0], [1], [0, 0, 1, 1], [], []>} : vector<16x32xf32>, vector<32x96xf32>, vector<16x96xf32> -> vector<16x96xf32>
    %c0_126 = arith.constant 0 : index
    %c0_127 = arith.constant 0 : index
    %c0_128 = arith.constant 0 : index
    %140 = vector.load %arg7[%c0_126, %c0_127, %c0_128] : memref<2x1x96xf32, #tpu.memory_space<vmem>>, vector<1x1x96xf32>
    %141 = vector.shape_cast %140 : vector<1x1x96xf32> to vector<1x96xf32>
    %142 = vector.broadcast %141 : vector<1x96xf32> to vector<16x96xf32>
    %143 = arith.addf %139, %142 : vector<16x96xf32>
    %144 = vector.extract_strided_slice %143 {offsets = [0, 0], sizes = [16, 32], strides = [1, 1]} : vector<16x96xf32> to vector<16x32xf32>
    %145 = vector.shape_cast %144 : vector<16x32xf32> to vector<2x8x32xf32>
    %146 = vector.extract_strided_slice %143 {offsets = [0, 32], sizes = [16, 32], strides = [1, 1]} : vector<16x96xf32> to vector<16x32xf32>
    %147 = vector.shape_cast %146 : vector<16x32xf32> to vector<2x8x32xf32>
    %148 = vector.extract_strided_slice %143 {offsets = [0, 64], sizes = [16, 32], strides = [1, 1]} : vector<16x96xf32> to vector<16x32xf32>
    %149 = vector.shape_cast %148 : vector<16x32xf32> to vector<2x8x32xf32>
    %c0_129 = arith.constant 0 : index
    %c0_130 = arith.constant 0 : index
    %c0_131 = arith.constant 0 : index
    %150 = vector.load %arg8[%c0_129, %c0_130, %c0_131] : memref<2x32x32xf32, #tpu.memory_space<vmem>>, vector<1x32x32xf32>
    %151 = vector.shape_cast %150 : vector<1x32x32xf32> to vector<32x32xf32>
    %c0_132 = arith.constant 0 : index
    %c0_133 = arith.constant 0 : index
    %c0_134 = arith.constant 0 : index
    %152 = vector.load %arg9[%c0_132, %c0_133, %c0_134] : memref<2x1x32xf32, #tpu.memory_space<vmem>>, vector<1x1x32xf32>
    %153 = vector.shape_cast %152 : vector<1x1x32xf32> to vector<1x32xf32>
    %154 = vector.extract_strided_slice %145 {offsets = [0, 0, 0], sizes = [2, 8, 16], strides = [1, 1, 1]} : vector<2x8x32xf32> to vector<2x8x16xf32>
    %155 = vector.extract_strided_slice %147 {offsets = [0, 0, 0], sizes = [2, 8, 16], strides = [1, 1, 1]} : vector<2x8x32xf32> to vector<2x8x16xf32>
    %156 = vector.extract_strided_slice %149 {offsets = [0, 0, 0], sizes = [2, 8, 16], strides = [1, 1, 1]} : vector<2x8x32xf32> to vector<2x8x16xf32>
    "tpu.trace_start"() <{level = 10 : i32, message = "bqd,bkd->bqk"}> : () -> ()
    %cst_135 = arith.constant dense<0.000000e+00> : vector<2x8x8xf32>
    %157 = tpu.matmul %154, %155, %cst_135 {dimension_numbers = #tpu.dot_dimension_numbers<[2], [2], [1], [1], [0, 0, 0, 1, 1, 1], [0], [0]>} : vector<2x8x16xf32>, vector<2x8x16xf32>, vector<2x8x8xf32> -> vector<2x8x8xf32>
    "tpu.trace_stop"() : () -> ()
    %cst_136 = arith.constant 2.500000e-01 : f32
    %158 = vector.broadcast %cst_136 : f32 to vector<2x8x8xf32>
    %159 = arith.mulf %157, %158 : vector<2x8x8xf32>
    %cst_137 = arith.constant dense<0xFF800000> : vector<2x8xf32>
    %160 = vector.multi_reduction <maximumf>, %159, %cst_137 [2] : vector<2x8x8xf32> to vector<2x8xf32>
    %161 = vector.shape_cast %160 : vector<2x8xf32> to vector<2x8x1xf32>
    %162 = vector.broadcast %161 : vector<2x8x1xf32> to vector<2x8x8xf32>
    %163 = arith.subf %159, %162 : vector<2x8x8xf32>
    %164 = math.exp %163 : vector<2x8x8xf32>
    %cst_138 = arith.constant dense<0.000000e+00> : vector<2x8xf32>
    %165 = vector.multi_reduction <add>, %164, %cst_138 [2] : vector<2x8x8xf32> to vector<2x8xf32>
    %166 = vector.shape_cast %165 : vector<2x8xf32> to vector<2x8x1xf32>
    %167 = vector.broadcast %166 : vector<2x8x1xf32> to vector<2x8x8xf32>
    %168 = arith.divf %164, %167 : vector<2x8x8xf32>
    "tpu.trace_start"() <{level = 10 : i32, message = "bqk,bkd->bqd"}> : () -> ()
    %cst_139 = arith.constant dense<0.000000e+00> : vector<2x8x16xf32>
    %169 = tpu.matmul %168, %156, %cst_139 {dimension_numbers = #tpu.dot_dimension_numbers<[2], [1], [1], [2], [0, 0, 0, 1, 1, 2], [0], [0]>} : vector<2x8x8xf32>, vector<2x8x16xf32>, vector<2x8x16xf32> -> vector<2x8x16xf32>
    "tpu.trace_stop"() : () -> ()
    %170 = vector.shape_cast %169 : vector<2x8x16xf32> to vector<16x16xf32>
    %171 = vector.extract_strided_slice %151 {offsets = [0, 0], sizes = [16, 32], strides = [1, 1]} : vector<32x32xf32> to vector<16x32xf32>
    %cst_140 = arith.constant dense<0.000000e+00> : vector<16x32xf32>
    %172 = tpu.matmul %170, %171, %cst_140 {dimension_numbers = #tpu.dot_dimension_numbers<[1], [0], [0], [1], [0, 0, 1, 1], [], []>} : vector<16x16xf32>, vector<16x32xf32>, vector<16x32xf32> -> vector<16x32xf32>
    %173 = vector.broadcast %153 : vector<1x32xf32> to vector<16x32xf32>
    %174 = arith.addf %173, %172 : vector<16x32xf32>
    %175 = vector.extract_strided_slice %145 {offsets = [0, 0, 16], sizes = [2, 8, 16], strides = [1, 1, 1]} : vector<2x8x32xf32> to vector<2x8x16xf32>
    %176 = vector.extract_strided_slice %147 {offsets = [0, 0, 16], sizes = [2, 8, 16], strides = [1, 1, 1]} : vector<2x8x32xf32> to vector<2x8x16xf32>
    %177 = vector.extract_strided_slice %149 {offsets = [0, 0, 16], sizes = [2, 8, 16], strides = [1, 1, 1]} : vector<2x8x32xf32> to vector<2x8x16xf32>
    "tpu.trace_start"() <{level = 10 : i32, message = "bqd,bkd->bqk"}> : () -> ()
    %cst_141 = arith.constant dense<0.000000e+00> : vector<2x8x8xf32>
    %178 = tpu.matmul %175, %176, %cst_141 {dimension_numbers = #tpu.dot_dimension_numbers<[2], [2], [1], [1], [0, 0, 0, 1, 1, 1], [0], [0]>} : vector<2x8x16xf32>, vector<2x8x16xf32>, vector<2x8x8xf32> -> vector<2x8x8xf32>
    "tpu.trace_stop"() : () -> ()
    %cst_142 = arith.constant 2.500000e-01 : f32
    %179 = vector.broadcast %cst_142 : f32 to vector<2x8x8xf32>
    %180 = arith.mulf %178, %179 : vector<2x8x8xf32>
    %cst_143 = arith.constant dense<0xFF800000> : vector<2x8xf32>
    %181 = vector.multi_reduction <maximumf>, %180, %cst_143 [2] : vector<2x8x8xf32> to vector<2x8xf32>
    %182 = vector.shape_cast %181 : vector<2x8xf32> to vector<2x8x1xf32>
    %183 = vector.broadcast %182 : vector<2x8x1xf32> to vector<2x8x8xf32>
    %184 = arith.subf %180, %183 : vector<2x8x8xf32>
    %185 = math.exp %184 : vector<2x8x8xf32>
    %cst_144 = arith.constant dense<0.000000e+00> : vector<2x8xf32>
    %186 = vector.multi_reduction <add>, %185, %cst_144 [2] : vector<2x8x8xf32> to vector<2x8xf32>
    %187 = vector.shape_cast %186 : vector<2x8xf32> to vector<2x8x1xf32>
    %188 = vector.broadcast %187 : vector<2x8x1xf32> to vector<2x8x8xf32>
    %189 = arith.divf %185, %188 : vector<2x8x8xf32>
    "tpu.trace_start"() <{level = 10 : i32, message = "bqk,bkd->bqd"}> : () -> ()
    %cst_145 = arith.constant dense<0.000000e+00> : vector<2x8x16xf32>
    %190 = tpu.matmul %189, %177, %cst_145 {dimension_numbers = #tpu.dot_dimension_numbers<[2], [1], [1], [2], [0, 0, 0, 1, 1, 2], [0], [0]>} : vector<2x8x8xf32>, vector<2x8x16xf32>, vector<2x8x16xf32> -> vector<2x8x16xf32>
    "tpu.trace_stop"() : () -> ()
    %191 = vector.shape_cast %190 : vector<2x8x16xf32> to vector<16x16xf32>
    %192 = vector.extract_strided_slice %151 {offsets = [16, 0], sizes = [16, 32], strides = [1, 1]} : vector<32x32xf32> to vector<16x32xf32>
    %cst_146 = arith.constant dense<0.000000e+00> : vector<16x32xf32>
    %193 = tpu.matmul %191, %192, %cst_146 {dimension_numbers = #tpu.dot_dimension_numbers<[1], [0], [0], [1], [0, 0, 1, 1], [], []>} : vector<16x16xf32>, vector<16x32xf32>, vector<16x32xf32> -> vector<16x32xf32>
    %194 = arith.addf %174, %193 : vector<16x32xf32>
    %195 = arith.addf %136, %194 : vector<16x32xf32>
    %c0_147 = arith.constant 0 : index
    %c0_148 = arith.constant 0 : index
    %c0_149 = arith.constant 0 : index
    %196 = vector.load %arg10[%c0_147, %c0_148, %c0_149] : memref<2x1x32xf32, #tpu.memory_space<vmem>>, vector<1x1x32xf32>
    %197 = vector.shape_cast %196 : vector<1x1x32xf32> to vector<1x32xf32>
    %c0_150 = arith.constant 0 : index
    %c0_151 = arith.constant 0 : index
    %c0_152 = arith.constant 0 : index
    %198 = vector.load %arg11[%c0_150, %c0_151, %c0_152] : memref<2x1x32xf32, #tpu.memory_space<vmem>>, vector<1x1x32xf32>
    %199 = vector.shape_cast %198 : vector<1x1x32xf32> to vector<1x32xf32>
    %cst_153 = arith.constant dense<0.000000e+00> : vector<16xf32>
    %200 = vector.multi_reduction <add>, %195, %cst_153 [1] : vector<16x32xf32> to vector<16xf32>
    %201 = vector.shape_cast %200 : vector<16xf32> to vector<16x1xf32>
    %cst_154 = arith.constant 3.200000e+01 : f32
    %202 = vector.broadcast %cst_154 : f32 to vector<16x1xf32>
    %203 = arith.divf %201, %202 : vector<16x1xf32>
    %204 = vector.broadcast %203 : vector<16x1xf32> to vector<16x32xf32>
    %205 = arith.subf %195, %204 : vector<16x32xf32>
    %206 = arith.mulf %205, %205 : vector<16x32xf32>
    %cst_155 = arith.constant dense<0.000000e+00> : vector<16xf32>
    %207 = vector.multi_reduction <add>, %206, %cst_155 [1] : vector<16x32xf32> to vector<16xf32>
    %208 = vector.shape_cast %207 : vector<16xf32> to vector<16x1xf32>
    %cst_156 = arith.constant 3.200000e+01 : f32
    %209 = vector.broadcast %cst_156 : f32 to vector<16x1xf32>
    %210 = arith.divf %208, %209 : vector<16x1xf32>
    %211 = vector.broadcast %203 : vector<16x1xf32> to vector<16x32xf32>
    %212 = arith.subf %195, %211 : vector<16x32xf32>
    %cst_157 = arith.constant 9.99999996E-13 : f32
    %213 = vector.broadcast %cst_157 : f32 to vector<16x1xf32>
    %214 = arith.addf %210, %213 : vector<16x1xf32>
    %215 = math.rsqrt %214 : vector<16x1xf32>
    %216 = vector.broadcast %215 : vector<16x1xf32> to vector<16x32xf32>
    %217 = arith.mulf %212, %216 : vector<16x32xf32>
    %218 = vector.broadcast %197 : vector<1x32xf32> to vector<16x32xf32>
    %219 = arith.mulf %217, %218 : vector<16x32xf32>
    %220 = vector.broadcast %199 : vector<1x32xf32> to vector<16x32xf32>
    %221 = arith.addf %219, %220 : vector<16x32xf32>
    %c0_158 = arith.constant 0 : index
    %c0_159 = arith.constant 0 : index
    %c0_160 = arith.constant 0 : index
    %222 = vector.load %arg12[%c0_158, %c0_159, %c0_160] : memref<2x32x64xf32, #tpu.memory_space<vmem>>, vector<1x32x64xf32>
    %223 = vector.shape_cast %222 : vector<1x32x64xf32> to vector<32x64xf32>
    %cst_161 = arith.constant dense<0.000000e+00> : vector<16x64xf32>
    %224 = tpu.matmul %221, %223, %cst_161 {dimension_numbers = #tpu.dot_dimension_numbers<[1], [0], [0], [1], [0, 0, 1, 1], [], []>} : vector<16x32xf32>, vector<32x64xf32>, vector<16x64xf32> -> vector<16x64xf32>
    %c0_162 = arith.constant 0 : index
    %c0_163 = arith.constant 0 : index
    %c0_164 = arith.constant 0 : index
    %225 = vector.load %arg13[%c0_162, %c0_163, %c0_164] : memref<2x1x64xf32, #tpu.memory_space<vmem>>, vector<1x1x64xf32>
    %226 = vector.shape_cast %225 : vector<1x1x64xf32> to vector<1x64xf32>
    %227 = vector.broadcast %226 : vector<1x64xf32> to vector<16x64xf32>
    %228 = arith.addf %224, %227 : vector<16x64xf32>
    %229 = arith.mulf %228, %228 : vector<16x64xf32>
    %230 = arith.mulf %228, %229 : vector<16x64xf32>
    %cst_165 = arith.constant 4.471500e-02 : f32
    %231 = vector.broadcast %cst_165 : f32 to vector<16x64xf32>
    %232 = arith.mulf %231, %230 : vector<16x64xf32>
    %233 = arith.addf %228, %232 : vector<16x64xf32>
    %cst_166 = arith.constant 0.797884583 : f32
    %234 = vector.broadcast %cst_166 : f32 to vector<16x64xf32>
    %235 = arith.mulf %234, %233 : vector<16x64xf32>
    %236 = math.tanh %235 : vector<16x64xf32>
    %cst_167 = arith.constant 1.000000e+00 : f32
    %237 = vector.broadcast %cst_167 : f32 to vector<16x64xf32>
    %238 = arith.addf %237, %236 : vector<16x64xf32>
    %cst_168 = arith.constant 5.000000e-01 : f32
    %239 = vector.broadcast %cst_168 : f32 to vector<16x64xf32>
    %240 = arith.mulf %239, %238 : vector<16x64xf32>
    %241 = arith.mulf %228, %240 : vector<16x64xf32>
    %c0_169 = arith.constant 0 : index
    %c0_170 = arith.constant 0 : index
    %c0_171 = arith.constant 0 : index
    %242 = vector.load %arg14[%c0_169, %c0_170, %c0_171] : memref<2x64x32xf32, #tpu.memory_space<vmem>>, vector<1x64x32xf32>
    %243 = vector.shape_cast %242 : vector<1x64x32xf32> to vector<64x32xf32>
    %cst_172 = arith.constant dense<0.000000e+00> : vector<16x32xf32>
    %244 = tpu.matmul %241, %243, %cst_172 {dimension_numbers = #tpu.dot_dimension_numbers<[1], [0], [0], [1], [0, 0, 1, 1], [], []>} : vector<16x64xf32>, vector<64x32xf32>, vector<16x32xf32> -> vector<16x32xf32>
    %c0_173 = arith.constant 0 : index
    %c0_174 = arith.constant 0 : index
    %c0_175 = arith.constant 0 : index
    %245 = vector.load %arg15[%c0_173, %c0_174, %c0_175] : memref<2x1x32xf32, #tpu.memory_space<vmem>>, vector<1x1x32xf32>
    %246 = vector.shape_cast %245 : vector<1x1x32xf32> to vector<1x32xf32>
    %247 = vector.broadcast %246 : vector<1x32xf32> to vector<16x32xf32>
    %248 = arith.addf %244, %247 : vector<16x32xf32>
    %249 = arith.addf %221, %248 : vector<16x32xf32>
    %c0_176 = arith.constant 0 : index
    %c0_177 = arith.constant 0 : index
    %c0_178 = arith.constant 0 : index
    %250 = vector.load %arg16[%c0_176, %c0_177, %c0_178] : memref<2x1x32xf32, #tpu.memory_space<vmem>>, vector<1x1x32xf32>
    %251 = vector.shape_cast %250 : vector<1x1x32xf32> to vector<1x32xf32>
    %c0_179 = arith.constant 0 : index
    %c0_180 = arith.constant 0 : index
    %c0_181 = arith.constant 0 : index
    %252 = vector.load %arg17[%c0_179, %c0_180, %c0_181] : memref<2x1x32xf32, #tpu.memory_space<vmem>>, vector<1x1x32xf32>
    %253 = vector.shape_cast %252 : vector<1x1x32xf32> to vector<1x32xf32>
    %cst_182 = arith.constant dense<0.000000e+00> : vector<16xf32>
    %254 = vector.multi_reduction <add>, %249, %cst_182 [1] : vector<16x32xf32> to vector<16xf32>
    %255 = vector.shape_cast %254 : vector<16xf32> to vector<16x1xf32>
    %cst_183 = arith.constant 3.200000e+01 : f32
    %256 = vector.broadcast %cst_183 : f32 to vector<16x1xf32>
    %257 = arith.divf %255, %256 : vector<16x1xf32>
    %258 = vector.broadcast %257 : vector<16x1xf32> to vector<16x32xf32>
    %259 = arith.subf %249, %258 : vector<16x32xf32>
    %260 = arith.mulf %259, %259 : vector<16x32xf32>
    %cst_184 = arith.constant dense<0.000000e+00> : vector<16xf32>
    %261 = vector.multi_reduction <add>, %260, %cst_184 [1] : vector<16x32xf32> to vector<16xf32>
    %262 = vector.shape_cast %261 : vector<16xf32> to vector<16x1xf32>
    %cst_185 = arith.constant 3.200000e+01 : f32
    %263 = vector.broadcast %cst_185 : f32 to vector<16x1xf32>
    %264 = arith.divf %262, %263 : vector<16x1xf32>
    %265 = vector.broadcast %257 : vector<16x1xf32> to vector<16x32xf32>
    %266 = arith.subf %249, %265 : vector<16x32xf32>
    %cst_186 = arith.constant 9.99999996E-13 : f32
    %267 = vector.broadcast %cst_186 : f32 to vector<16x1xf32>
    %268 = arith.addf %264, %267 : vector<16x1xf32>
    %269 = math.rsqrt %268 : vector<16x1xf32>
    %270 = vector.broadcast %269 : vector<16x1xf32> to vector<16x32xf32>
    %271 = arith.mulf %266, %270 : vector<16x32xf32>
    %272 = vector.broadcast %251 : vector<1x32xf32> to vector<16x32xf32>
    %273 = arith.mulf %271, %272 : vector<16x32xf32>
    %274 = vector.broadcast %253 : vector<1x32xf32> to vector<16x32xf32>
    %275 = arith.addf %273, %274 : vector<16x32xf32>
    %c1_187 = arith.constant 1 : index
    %c0_188 = arith.constant 0 : index
    %c0_189 = arith.constant 0 : index
    %276 = vector.load %arg6[%c1_187, %c0_188, %c0_189] : memref<2x32x96xf32, #tpu.memory_space<vmem>>, vector<1x32x96xf32>
    %277 = vector.shape_cast %276 : vector<1x32x96xf32> to vector<32x96xf32>
    %cst_190 = arith.constant dense<0.000000e+00> : vector<16x96xf32>
    %278 = tpu.matmul %275, %277, %cst_190 {dimension_numbers = #tpu.dot_dimension_numbers<[1], [0], [0], [1], [0, 0, 1, 1], [], []>} : vector<16x32xf32>, vector<32x96xf32>, vector<16x96xf32> -> vector<16x96xf32>
    %c1_191 = arith.constant 1 : index
    %c0_192 = arith.constant 0 : index
    %c0_193 = arith.constant 0 : index
    %279 = vector.load %arg7[%c1_191, %c0_192, %c0_193] : memref<2x1x96xf32, #tpu.memory_space<vmem>>, vector<1x1x96xf32>
    %280 = vector.shape_cast %279 : vector<1x1x96xf32> to vector<1x96xf32>
    %281 = vector.broadcast %280 : vector<1x96xf32> to vector<16x96xf32>
    %282 = arith.addf %278, %281 : vector<16x96xf32>
    %283 = vector.extract_strided_slice %282 {offsets = [0, 0], sizes = [16, 32], strides = [1, 1]} : vector<16x96xf32> to vector<16x32xf32>
    %284 = vector.shape_cast %283 : vector<16x32xf32> to vector<2x8x32xf32>
    %285 = vector.extract_strided_slice %282 {offsets = [0, 32], sizes = [16, 32], strides = [1, 1]} : vector<16x96xf32> to vector<16x32xf32>
    %286 = vector.shape_cast %285 : vector<16x32xf32> to vector<2x8x32xf32>
    %287 = vector.extract_strided_slice %282 {offsets = [0, 64], sizes = [16, 32], strides = [1, 1]} : vector<16x96xf32> to vector<16x32xf32>
    %288 = vector.shape_cast %287 : vector<16x32xf32> to vector<2x8x32xf32>
    %c1_194 = arith.constant 1 : index
    %c0_195 = arith.constant 0 : index
    %c0_196 = arith.constant 0 : index
    %289 = vector.load %arg8[%c1_194, %c0_195, %c0_196] : memref<2x32x32xf32, #tpu.memory_space<vmem>>, vector<1x32x32xf32>
    %290 = vector.shape_cast %289 : vector<1x32x32xf32> to vector<32x32xf32>
    %c1_197 = arith.constant 1 : index
    %c0_198 = arith.constant 0 : index
    %c0_199 = arith.constant 0 : index
    %291 = vector.load %arg9[%c1_197, %c0_198, %c0_199] : memref<2x1x32xf32, #tpu.memory_space<vmem>>, vector<1x1x32xf32>
    %292 = vector.shape_cast %291 : vector<1x1x32xf32> to vector<1x32xf32>
    %293 = vector.extract_strided_slice %284 {offsets = [0, 0, 0], sizes = [2, 8, 16], strides = [1, 1, 1]} : vector<2x8x32xf32> to vector<2x8x16xf32>
    %294 = vector.extract_strided_slice %286 {offsets = [0, 0, 0], sizes = [2, 8, 16], strides = [1, 1, 1]} : vector<2x8x32xf32> to vector<2x8x16xf32>
    %295 = vector.extract_strided_slice %288 {offsets = [0, 0, 0], sizes = [2, 8, 16], strides = [1, 1, 1]} : vector<2x8x32xf32> to vector<2x8x16xf32>
    "tpu.trace_start"() <{level = 10 : i32, message = "bqd,bkd->bqk"}> : () -> ()
    %cst_200 = arith.constant dense<0.000000e+00> : vector<2x8x8xf32>
    %296 = tpu.matmul %293, %294, %cst_200 {dimension_numbers = #tpu.dot_dimension_numbers<[2], [2], [1], [1], [0, 0, 0, 1, 1, 1], [0], [0]>} : vector<2x8x16xf32>, vector<2x8x16xf32>, vector<2x8x8xf32> -> vector<2x8x8xf32>
    "tpu.trace_stop"() : () -> ()
    %cst_201 = arith.constant 2.500000e-01 : f32
    %297 = vector.broadcast %cst_201 : f32 to vector<2x8x8xf32>
    %298 = arith.mulf %296, %297 : vector<2x8x8xf32>
    %cst_202 = arith.constant dense<0xFF800000> : vector<2x8xf32>
    %299 = vector.multi_reduction <maximumf>, %298, %cst_202 [2] : vector<2x8x8xf32> to vector<2x8xf32>
    %300 = vector.shape_cast %299 : vector<2x8xf32> to vector<2x8x1xf32>
    %301 = vector.broadcast %300 : vector<2x8x1xf32> to vector<2x8x8xf32>
    %302 = arith.subf %298, %301 : vector<2x8x8xf32>
    %303 = math.exp %302 : vector<2x8x8xf32>
    %cst_203 = arith.constant dense<0.000000e+00> : vector<2x8xf32>
    %304 = vector.multi_reduction <add>, %303, %cst_203 [2] : vector<2x8x8xf32> to vector<2x8xf32>
    %305 = vector.shape_cast %304 : vector<2x8xf32> to vector<2x8x1xf32>
    %306 = vector.broadcast %305 : vector<2x8x1xf32> to vector<2x8x8xf32>
    %307 = arith.divf %303, %306 : vector<2x8x8xf32>
    "tpu.trace_start"() <{level = 10 : i32, message = "bqk,bkd->bqd"}> : () -> ()
    %cst_204 = arith.constant dense<0.000000e+00> : vector<2x8x16xf32>
    %308 = tpu.matmul %307, %295, %cst_204 {dimension_numbers = #tpu.dot_dimension_numbers<[2], [1], [1], [2], [0, 0, 0, 1, 1, 2], [0], [0]>} : vector<2x8x8xf32>, vector<2x8x16xf32>, vector<2x8x16xf32> -> vector<2x8x16xf32>
    "tpu.trace_stop"() : () -> ()
    %309 = vector.shape_cast %308 : vector<2x8x16xf32> to vector<16x16xf32>
    %310 = vector.extract_strided_slice %290 {offsets = [0, 0], sizes = [16, 32], strides = [1, 1]} : vector<32x32xf32> to vector<16x32xf32>
    %cst_205 = arith.constant dense<0.000000e+00> : vector<16x32xf32>
    %311 = tpu.matmul %309, %310, %cst_205 {dimension_numbers = #tpu.dot_dimension_numbers<[1], [0], [0], [1], [0, 0, 1, 1], [], []>} : vector<16x16xf32>, vector<16x32xf32>, vector<16x32xf32> -> vector<16x32xf32>
    %312 = vector.broadcast %292 : vector<1x32xf32> to vector<16x32xf32>
    %313 = arith.addf %312, %311 : vector<16x32xf32>
    %314 = vector.extract_strided_slice %284 {offsets = [0, 0, 16], sizes = [2, 8, 16], strides = [1, 1, 1]} : vector<2x8x32xf32> to vector<2x8x16xf32>
    %315 = vector.extract_strided_slice %286 {offsets = [0, 0, 16], sizes = [2, 8, 16], strides = [1, 1, 1]} : vector<2x8x32xf32> to vector<2x8x16xf32>
    %316 = vector.extract_strided_slice %288 {offsets = [0, 0, 16], sizes = [2, 8, 16], strides = [1, 1, 1]} : vector<2x8x32xf32> to vector<2x8x16xf32>
    "tpu.trace_start"() <{level = 10 : i32, message = "bqd,bkd->bqk"}> : () -> ()
    %cst_206 = arith.constant dense<0.000000e+00> : vector<2x8x8xf32>
    %317 = tpu.matmul %314, %315, %cst_206 {dimension_numbers = #tpu.dot_dimension_numbers<[2], [2], [1], [1], [0, 0, 0, 1, 1, 1], [0], [0]>} : vector<2x8x16xf32>, vector<2x8x16xf32>, vector<2x8x8xf32> -> vector<2x8x8xf32>
    "tpu.trace_stop"() : () -> ()
    %cst_207 = arith.constant 2.500000e-01 : f32
    %318 = vector.broadcast %cst_207 : f32 to vector<2x8x8xf32>
    %319 = arith.mulf %317, %318 : vector<2x8x8xf32>
    %cst_208 = arith.constant dense<0xFF800000> : vector<2x8xf32>
    %320 = vector.multi_reduction <maximumf>, %319, %cst_208 [2] : vector<2x8x8xf32> to vector<2x8xf32>
    %321 = vector.shape_cast %320 : vector<2x8xf32> to vector<2x8x1xf32>
    %322 = vector.broadcast %321 : vector<2x8x1xf32> to vector<2x8x8xf32>
    %323 = arith.subf %319, %322 : vector<2x8x8xf32>
    %324 = math.exp %323 : vector<2x8x8xf32>
    %cst_209 = arith.constant dense<0.000000e+00> : vector<2x8xf32>
    %325 = vector.multi_reduction <add>, %324, %cst_209 [2] : vector<2x8x8xf32> to vector<2x8xf32>
    %326 = vector.shape_cast %325 : vector<2x8xf32> to vector<2x8x1xf32>
    %327 = vector.broadcast %326 : vector<2x8x1xf32> to vector<2x8x8xf32>
    %328 = arith.divf %324, %327 : vector<2x8x8xf32>
    "tpu.trace_start"() <{level = 10 : i32, message = "bqk,bkd->bqd"}> : () -> ()
    %cst_210 = arith.constant dense<0.000000e+00> : vector<2x8x16xf32>
    %329 = tpu.matmul %328, %316, %cst_210 {dimension_numbers = #tpu.dot_dimension_numbers<[2], [1], [1], [2], [0, 0, 0, 1, 1, 2], [0], [0]>} : vector<2x8x8xf32>, vector<2x8x16xf32>, vector<2x8x16xf32> -> vector<2x8x16xf32>
    "tpu.trace_stop"() : () -> ()
    %330 = vector.shape_cast %329 : vector<2x8x16xf32> to vector<16x16xf32>
    %331 = vector.extract_strided_slice %290 {offsets = [16, 0], sizes = [16, 32], strides = [1, 1]} : vector<32x32xf32> to vector<16x32xf32>
    %cst_211 = arith.constant dense<0.000000e+00> : vector<16x32xf32>
    %332 = tpu.matmul %330, %331, %cst_211 {dimension_numbers = #tpu.dot_dimension_numbers<[1], [0], [0], [1], [0, 0, 1, 1], [], []>} : vector<16x16xf32>, vector<16x32xf32>, vector<16x32xf32> -> vector<16x32xf32>
    %333 = arith.addf %313, %332 : vector<16x32xf32>
    %334 = arith.addf %275, %333 : vector<16x32xf32>
    %c1_212 = arith.constant 1 : index
    %c0_213 = arith.constant 0 : index
    %c0_214 = arith.constant 0 : index
    %335 = vector.load %arg10[%c1_212, %c0_213, %c0_214] : memref<2x1x32xf32, #tpu.memory_space<vmem>>, vector<1x1x32xf32>
    %336 = vector.shape_cast %335 : vector<1x1x32xf32> to vector<1x32xf32>
    %c1_215 = arith.constant 1 : index
    %c0_216 = arith.constant 0 : index
    %c0_217 = arith.constant 0 : index
    %337 = vector.load %arg11[%c1_215, %c0_216, %c0_217] : memref<2x1x32xf32, #tpu.memory_space<vmem>>, vector<1x1x32xf32>
    %338 = vector.shape_cast %337 : vector<1x1x32xf32> to vector<1x32xf32>
    %cst_218 = arith.constant dense<0.000000e+00> : vector<16xf32>
    %339 = vector.multi_reduction <add>, %334, %cst_218 [1] : vector<16x32xf32> to vector<16xf32>
    %340 = vector.shape_cast %339 : vector<16xf32> to vector<16x1xf32>
    %cst_219 = arith.constant 3.200000e+01 : f32
    %341 = vector.broadcast %cst_219 : f32 to vector<16x1xf32>
    %342 = arith.divf %340, %341 : vector<16x1xf32>
    %343 = vector.broadcast %342 : vector<16x1xf32> to vector<16x32xf32>
    %344 = arith.subf %334, %343 : vector<16x32xf32>
    %345 = arith.mulf %344, %344 : vector<16x32xf32>
    %cst_220 = arith.constant dense<0.000000e+00> : vector<16xf32>
    %346 = vector.multi_reduction <add>, %345, %cst_220 [1] : vector<16x32xf32> to vector<16xf32>
    %347 = vector.shape_cast %346 : vector<16xf32> to vector<16x1xf32>
    %cst_221 = arith.constant 3.200000e+01 : f32
    %348 = vector.broadcast %cst_221 : f32 to vector<16x1xf32>
    %349 = arith.divf %347, %348 : vector<16x1xf32>
    %350 = vector.broadcast %342 : vector<16x1xf32> to vector<16x32xf32>
    %351 = arith.subf %334, %350 : vector<16x32xf32>
    %cst_222 = arith.constant 9.99999996E-13 : f32
    %352 = vector.broadcast %cst_222 : f32 to vector<16x1xf32>
    %353 = arith.addf %349, %352 : vector<16x1xf32>
    %354 = math.rsqrt %353 : vector<16x1xf32>
    %355 = vector.broadcast %354 : vector<16x1xf32> to vector<16x32xf32>
    %356 = arith.mulf %351, %355 : vector<16x32xf32>
    %357 = vector.broadcast %336 : vector<1x32xf32> to vector<16x32xf32>
    %358 = arith.mulf %356, %357 : vector<16x32xf32>
    %359 = vector.broadcast %338 : vector<1x32xf32> to vector<16x32xf32>
    %360 = arith.addf %358, %359 : vector<16x32xf32>
    %c1_223 = arith.constant 1 : index
    %c0_224 = arith.constant 0 : index
    %c0_225 = arith.constant 0 : index
    %361 = vector.load %arg12[%c1_223, %c0_224, %c0_225] : memref<2x32x64xf32, #tpu.memory_space<vmem>>, vector<1x32x64xf32>
    %362 = vector.shape_cast %361 : vector<1x32x64xf32> to vector<32x64xf32>
    %cst_226 = arith.constant dense<0.000000e+00> : vector<16x64xf32>
    %363 = tpu.matmul %360, %362, %cst_226 {dimension_numbers = #tpu.dot_dimension_numbers<[1], [0], [0], [1], [0, 0, 1, 1], [], []>} : vector<16x32xf32>, vector<32x64xf32>, vector<16x64xf32> -> vector<16x64xf32>
    %c1_227 = arith.constant 1 : index
    %c0_228 = arith.constant 0 : index
    %c0_229 = arith.constant 0 : index
    %364 = vector.load %arg13[%c1_227, %c0_228, %c0_229] : memref<2x1x64xf32, #tpu.memory_space<vmem>>, vector<1x1x64xf32>
    %365 = vector.shape_cast %364 : vector<1x1x64xf32> to vector<1x64xf32>
    %366 = vector.broadcast %365 : vector<1x64xf32> to vector<16x64xf32>
    %367 = arith.addf %363, %366 : vector<16x64xf32>
    %368 = arith.mulf %367, %367 : vector<16x64xf32>
    %369 = arith.mulf %367, %368 : vector<16x64xf32>
    %cst_230 = arith.constant 4.471500e-02 : f32
    %370 = vector.broadcast %cst_230 : f32 to vector<16x64xf32>
    %371 = arith.mulf %370, %369 : vector<16x64xf32>
    %372 = arith.addf %367, %371 : vector<16x64xf32>
    %cst_231 = arith.constant 0.797884583 : f32
    %373 = vector.broadcast %cst_231 : f32 to vector<16x64xf32>
    %374 = arith.mulf %373, %372 : vector<16x64xf32>
    %375 = math.tanh %374 : vector<16x64xf32>
    %cst_232 = arith.constant 1.000000e+00 : f32
    %376 = vector.broadcast %cst_232 : f32 to vector<16x64xf32>
    %377 = arith.addf %376, %375 : vector<16x64xf32>
    %cst_233 = arith.constant 5.000000e-01 : f32
    %378 = vector.broadcast %cst_233 : f32 to vector<16x64xf32>
    %379 = arith.mulf %378, %377 : vector<16x64xf32>
    %380 = arith.mulf %367, %379 : vector<16x64xf32>
    %c1_234 = arith.constant 1 : index
    %c0_235 = arith.constant 0 : index
    %c0_236 = arith.constant 0 : index
    %381 = vector.load %arg14[%c1_234, %c0_235, %c0_236] : memref<2x64x32xf32, #tpu.memory_space<vmem>>, vector<1x64x32xf32>
    %382 = vector.shape_cast %381 : vector<1x64x32xf32> to vector<64x32xf32>
    %cst_237 = arith.constant dense<0.000000e+00> : vector<16x32xf32>
    %383 = tpu.matmul %380, %382, %cst_237 {dimension_numbers = #tpu.dot_dimension_numbers<[1], [0], [0], [1], [0, 0, 1, 1], [], []>} : vector<16x64xf32>, vector<64x32xf32>, vector<16x32xf32> -> vector<16x32xf32>
    %c1_238 = arith.constant 1 : index
    %c0_239 = arith.constant 0 : index
    %c0_240 = arith.constant 0 : index
    %384 = vector.load %arg15[%c1_238, %c0_239, %c0_240] : memref<2x1x32xf32, #tpu.memory_space<vmem>>, vector<1x1x32xf32>
    %385 = vector.shape_cast %384 : vector<1x1x32xf32> to vector<1x32xf32>
    %386 = vector.broadcast %385 : vector<1x32xf32> to vector<16x32xf32>
    %387 = arith.addf %383, %386 : vector<16x32xf32>
    %388 = arith.addf %360, %387 : vector<16x32xf32>
    %c1_241 = arith.constant 1 : index
    %c0_242 = arith.constant 0 : index
    %c0_243 = arith.constant 0 : index
    %389 = vector.load %arg16[%c1_241, %c0_242, %c0_243] : memref<2x1x32xf32, #tpu.memory_space<vmem>>, vector<1x1x32xf32>
    %390 = vector.shape_cast %389 : vector<1x1x32xf32> to vector<1x32xf32>
    %c1_244 = arith.constant 1 : index
    %c0_245 = arith.constant 0 : index
    %c0_246 = arith.constant 0 : index
    %391 = vector.load %arg17[%c1_244, %c0_245, %c0_246] : memref<2x1x32xf32, #tpu.memory_space<vmem>>, vector<1x1x32xf32>
    %392 = vector.shape_cast %391 : vector<1x1x32xf32> to vector<1x32xf32>
    %cst_247 = arith.constant dense<0.000000e+00> : vector<16xf32>
    %393 = vector.multi_reduction <add>, %388, %cst_247 [1] : vector<16x32xf32> to vector<16xf32>
    %394 = vector.shape_cast %393 : vector<16xf32> to vector<16x1xf32>
    %cst_248 = arith.constant 3.200000e+01 : f32
    %395 = vector.broadcast %cst_248 : f32 to vector<16x1xf32>
    %396 = arith.divf %394, %395 : vector<16x1xf32>
    %397 = vector.broadcast %396 : vector<16x1xf32> to vector<16x32xf32>
    %398 = arith.subf %388, %397 : vector<16x32xf32>
    %399 = arith.mulf %398, %398 : vector<16x32xf32>
    %cst_249 = arith.constant dense<0.000000e+00> : vector<16xf32>
    %400 = vector.multi_reduction <add>, %399, %cst_249 [1] : vector<16x32xf32> to vector<16xf32>
    %401 = vector.shape_cast %400 : vector<16xf32> to vector<16x1xf32>
    %cst_250 = arith.constant 3.200000e+01 : f32
    %402 = vector.broadcast %cst_250 : f32 to vector<16x1xf32>
    %403 = arith.divf %401, %402 : vector<16x1xf32>
    %404 = vector.broadcast %396 : vector<16x1xf32> to vector<16x32xf32>
    %405 = arith.subf %388, %404 : vector<16x32xf32>
    %cst_251 = arith.constant 9.99999996E-13 : f32
    %406 = vector.broadcast %cst_251 : f32 to vector<16x1xf32>
    %407 = arith.addf %403, %406 : vector<16x1xf32>
    %408 = math.rsqrt %407 : vector<16x1xf32>
    %409 = vector.broadcast %408 : vector<16x1xf32> to vector<16x32xf32>
    %410 = arith.mulf %405, %409 : vector<16x32xf32>
    %411 = vector.broadcast %390 : vector<1x32xf32> to vector<16x32xf32>
    %412 = arith.mulf %410, %411 : vector<16x32xf32>
    %413 = vector.broadcast %392 : vector<1x32xf32> to vector<16x32xf32>
    %414 = arith.addf %412, %413 : vector<16x32xf32>
    %c0_252 = arith.constant 0 : index
    %c0_253 = arith.constant 0 : index
    %415 = vector.load %arg18[%c0_252, %c0_253] : memref<32x128xf32, #tpu.memory_space<vmem>>, vector<32x128xf32>
    %cst_254 = arith.constant dense<0.000000e+00> : vector<16x128xf32>
    %416 = tpu.matmul %414, %415, %cst_254 {dimension_numbers = #tpu.dot_dimension_numbers<[1], [0], [0], [1], [0, 0, 1, 1], [], []>} : vector<16x32xf32>, vector<32x128xf32>, vector<16x128xf32> -> vector<16x128xf32>
    %c0_255 = arith.constant 0 : index
    %c0_256 = arith.constant 0 : index
    %417 = vector.load %arg19[%c0_255, %c0_256] : memref<1x128xf32, #tpu.memory_space<vmem>>, vector<1x128xf32>
    %418 = vector.broadcast %417 : vector<1x128xf32> to vector<16x128xf32>
    %419 = arith.addf %416, %418 : vector<16x128xf32>
    %c0_257 = arith.constant 0 : index
    %c0_258 = arith.constant 0 : index
    %420 = vector.load %arg21[%c0_257, %c0_258] : memref<16x128xf32, #tpu.memory_space<vmem>>, vector<16x128xf32>
    tpu.vector_store %arg21[%c0_257, %c0_258], %419 {strides = array<i32>} : memref<16x128xf32, #tpu.memory_space<vmem>>, vector<16x128xf32>,
    %c0_259 = arith.constant 0 : index
    %c0_260 = arith.constant 0 : index
    %421 = vector.load %arg20[%c0_259, %c0_260] : memref<16x1xi32, #tpu.memory_space<vmem>>, vector<16x1xi32>
    %c-100_i32 = arith.constant -100 : i32
    %422 = vector.broadcast %c-100_i32 : i32 to vector<16x1xi32>
    %423 = arith.cmpi ne, %421, %422 : vector<16x1xi32>
    %424 = arith.extui %423 : vector<16x1xi1> to vector<16x1xi32>
    %425 = arith.sitofp %424 : vector<16x1xi32> to vector<16x1xf32>
    %426 = tpu.iota {dimensions = array<i32: 1>} : vector<16x128xi32>
    %c5_i32 = arith.constant 5 : i32
    %427 = vector.broadcast %c5_i32 : i32 to vector<16x128xi32>
    %428 = arith.cmpi slt, %426, %427 : vector<16x128xi32>
    %cst_261 = arith.constant -1.000000e+30 : f32
    %429 = vector.broadcast %cst_261 : f32 to vector<16x128xf32>
    %430 = arith.select %428, %419, %429 : vector<16x128xi1>, vector<16x128xf32>
    %cst_262 = arith.constant dense<0xFF800000> : vector<16xf32>
    %431 = vector.multi_reduction <maximumf>, %430, %cst_262 [1] : vector<16x128xf32> to vector<16xf32>
    %432 = vector.shape_cast %431 : vector<16xf32> to vector<16x1xf32>
    %433 = vector.broadcast %432 : vector<16x1xf32> to vector<16x128xf32>
    %434 = arith.subf %430, %433 : vector<16x128xf32>
    %435 = math.exp %434 : vector<16x128xf32>
    %cst_263 = arith.constant 0.000000e+00 : f32
    %436 = vector.broadcast %cst_263 : f32 to vector<16x128xf32>
    %437 = arith.select %428, %435, %436 : vector<16x128xi1>, vector<16x128xf32>
    %cst_264 = arith.constant dense<0.000000e+00> : vector<16xf32>
    %438 = vector.multi_reduction <add>, %437, %cst_264 [1] : vector<16x128xf32> to vector<16xf32>
    %439 = vector.shape_cast %438 : vector<16xf32> to vector<16x1xf32>
    %440 = math.log %439 : vector<16x1xf32>
    %441 = arith.addf %432, %440 : vector<16x1xf32>
    %442 = vector.broadcast %421 : vector<16x1xi32> to vector<16x128xi32>
    %443 = arith.cmpi eq, %426, %442 : vector<16x128xi32>
    %cst_265 = arith.constant 0.000000e+00 : f32
    %444 = vector.broadcast %cst_265 : f32 to vector<16x128xf32>
    %445 = arith.select %443, %419, %444 : vector<16x128xi1>, vector<16x128xf32>
    %cst_266 = arith.constant dense<0.000000e+00> : vector<16xf32>
    %446 = vector.multi_reduction <add>, %445, %cst_266 [1] : vector<16x128xf32> to vector<16xf32>
    %447 = vector.shape_cast %446 : vector<16xf32> to vector<16x1xf32>
    %448 = arith.subf %441, %447 : vector<16x1xf32>
    %449 = arith.mulf %448, %425 : vector<16x1xf32>
    %450 = vector.shape_cast %425 : vector<16x1xf32> to vector<1x16x1xf32>
    %cst_267 = arith.constant dense<0.000000e+00> : vector<1xf32>
    %451 = vector.multi_reduction <add>, %450, %cst_267 [1, 2] : vector<1x16x1xf32> to vector<1xf32>
    %452 = vector.shape_cast %451 : vector<1xf32> to vector<1x1x1xf32>
    %453 = vector.extract %452[0, 0, 0] : f32 from vector<1x1x1xf32>
    %454 = vector.broadcast %453 : f32 to vector<1x1xf32>
    %cst_268 = arith.constant 1.000000e+00 : f32
    %455 = vector.broadcast %cst_268 : f32 to vector<1x1xf32>
    %456 = arith.maximumf %454, %455 : vector<1x1xf32>
    %457 = vector.shape_cast %449 : vector<16x1xf32> to vector<1x16x1xf32>
    %cst_269 = arith.constant dense<0.000000e+00> : vector<1xf32>
    %458 = vector.multi_reduction <add>, %457, %cst_269 [1, 2] : vector<1x16x1xf32> to vector<1xf32>
    %459 = vector.shape_cast %458 : vector<1xf32> to vector<1x1x1xf32>
    %460 = vector.extract %459[0, 0, 0] : f32 from vector<1x1x1xf32>
    %461 = vector.broadcast %460 : f32 to vector<1x1xf32>
    %462 = arith.divf %461, %456 : vector<1x1xf32>
    %c0_270 = arith.constant 0 : index
    %c0_271 = arith.constant 0 : index
    %463 = vector.load %arg22[%c0_270, %c0_271] : memref<1x1xf32, #tpu.memory_space<vmem>>, vector<1x1xf32>
    tpu.vector_store %arg22[%c0_270, %c0_271], %462 {strides = array<i32>} : memref<1x1xf32, #tpu.memory_space<vmem>>, vector<1x1xf32>,
    return
  }
  func.func @transform_0(%arg0: i32, %arg1: memref<2x8xi32, #tpu.memory_space<smem>>) -> (i32, i32, i32) {
    %c0_i32 = arith.constant 0 : i32
    %c0_i32_0 = arith.constant 0 : i32
    %c0_i32_1 = arith.constant 0 : i32
    %c0_i32_2 = arith.constant 0 : i32
    return %c0_i32, %c0_i32_0, %c0_i32_1 : i32, i32, i32
  }
  func.func @transform_1(%arg0: i32, %arg1: memref<2x8xi32, #tpu.memory_space<smem>>) -> (i32, i32) {
    %c0_i32 = arith.constant 0 : i32
    %c0_i32_0 = arith.constant 0 : i32
    %c0_i32_1 = arith.constant 0 : i32
    return %c0_i32, %c0_i32_0 : i32, i32
  }
  func.func @transform_2(%arg0: i32, %arg1: memref<2x8xi32, #tpu.memory_space<smem>>) -> (i32, i32) {
    %c0_i32 = arith.constant 0 : i32
    %c0_i32_0 = arith.constant 0 : i32
    %c0_i32_1 = arith.constant 0 : i32
    return %c0_i32, %c0_i32_0 : i32, i32
  }
  func.func @transform_3(%arg0: i32, %arg1: memref<2x8xi32, #tpu.memory_space<smem>>) -> (i32, i32) {
    %c0_i32 = arith.constant 0 : i32
    %c0_i32_0 = arith.constant 0 : i32
    %c0_i32_1 = arith.constant 0 : i32
    return %c0_i32, %c0_i32_0 : i32, i32
  }
  func.func @transform_4(%arg0: i32, %arg1: memref<2x8xi32, #tpu.memory_space<smem>>) -> (i32, i32, i32) {
    %c0_i32 = arith.constant 0 : i32
    %c0_i32_0 = arith.constant 0 : i32
    %c0_i32_1 = arith.constant 0 : i32
    %c0_i32_2 = arith.constant 0 : i32
    return %c0_i32, %c0_i32_0, %c0_i32_1 : i32, i32, i32
  }
  func.func @transform_5(%arg0: i32, %arg1: memref<2x8xi32, #tpu.memory_space<smem>>) -> (i32, i32, i32) {
    %c0_i32 = arith.constant 0 : i32
    %c0_i32_0 = arith.constant 0 : i32
    %c0_i32_1 = arith.constant 0 : i32
    %c0_i32_2 = arith.constant 0 : i32
    return %c0_i32, %c0_i32_0, %c0_i32_1 : i32, i32, i32
  }
  func.func @transform_6(%arg0: i32, %arg1: memref<2x8xi32, #tpu.memory_space<smem>>) -> (i32, i32, i32) {
    %c0_i32 = arith.constant 0 : i32
    %c0_i32_0 = arith.constant 0 : i32
    %c0_i32_1 = arith.constant 0 : i32
    %c0_i32_2 = arith.constant 0 : i32
    return %c0_i32, %c0_i32_0, %c0_i32_1 : i32, i32, i32
  }
  func.func @transform_7(%arg0: i32, %arg1: memref<2x8xi32, #tpu.memory_space<smem>>) -> (i32, i32, i32) {
    %c0_i32 = arith.constant 0 : i32
    %c0_i32_0 = arith.constant 0 : i32
    %c0_i32_1 = arith.constant 0 : i32
    %c0_i32_2 = arith.constant 0 : i32
    return %c0_i32, %c0_i32_0, %c0_i32_1 : i32, i32, i32
  }
  func.func @transform_8(%arg0: i32, %arg1: memref<2x8xi32, #tpu.memory_space<smem>>) -> (i32, i32, i32) {
    %c0_i32 = arith.constant 0 : i32
    %c0_i32_0 = arith.constant 0 : i32
    %c0_i32_1 = arith.constant 0 : i32
    %c0_i32_2 = arith.constant 0 : i32
    return %c0_i32, %c0_i32_0, %c0_i32_1 : i32, i32, i32
  }
  func.func @transform_9(%arg0: i32, %arg1: memref<2x8xi32, #tpu.memory_space<smem>>) -> (i32, i32, i32) {
    %c0_i32 = arith.constant 0 : i32
    %c0_i32_0 = arith.constant 0 : i32
    %c0_i32_1 = arith.constant 0 : i32
    %c0_i32_2 = arith.constant 0 : i32
    return %c0_i32, %c0_i32_0, %c0_i32_1 : i32, i32, i32
  }
  func.func @transform_10(%arg0: i32, %arg1: memref<2x8xi32, #tpu.memory_space<smem>>) -> (i32, i32, i32) {
    %c0_i32 = arith.constant 0 : i32
    %c0_i32_0 = arith.constant 0 : i32
    %c0_i32_1 = arith.constant 0 : i32
    %c0_i32_2 = arith.constant 0 : i32
    return %c0_i32, %c0_i32_0, %c0_i32_1 : i32, i32, i32
  }
  func.func @transform_11(%arg0: i32, %arg1: memref<2x8xi32, #tpu.memory_space<smem>>) -> (i32, i32, i32) {
    %c0_i32 = arith.constant 0 : i32
    %c0_i32_0 = arith.constant 0 : i32
    %c0_i32_1 = arith.constant 0 : i32
    %c0_i32_2 = arith.constant 0 : i32
    return %c0_i32, %c0_i32_0, %c0_i32_1 : i32, i32, i32
  }
  func.func @transform_12(%arg0: i32, %arg1: memref<2x8xi32, #tpu.memory_space<smem>>) -> (i32, i32, i32) {
    %c0_i32 = arith.constant 0 : i32
    %c0_i32_0 = arith.constant 0 : i32
    %c0_i32_1 = arith.constant 0 : i32
    %c0_i32_2 = arith.constant 0 : i32
    return %c0_i32, %c0_i32_0, %c0_i32_1 : i32, i32, i32
  }
  func.func @transform_13(%arg0: i32, %arg1: memref<2x8xi32, #tpu.memory_space<smem>>) -> (i32, i32, i32) {
    %c0_i32 = arith.constant 0 : i32
    %c0_i32_0 = arith.constant 0 : i32
    %c0_i32_1 = arith.constant 0 : i32
    %c0_i32_2 = arith.constant 0 : i32
    return %c0_i32, %c0_i32_0, %c0_i32_1 : i32, i32, i32
  }
  func.func @transform_14(%arg0: i32, %arg1: memref<2x8xi32, #tpu.memory_space<smem>>) -> (i32, i32, i32) {
    %c0_i32 = arith.constant 0 : i32
    %c0_i32_0 = arith.constant 0 : i32
    %c0_i32_1 = arith.constant 0 : i32
    %c0_i32_2 = arith.constant 0 : i32
    return %c0_i32, %c0_i32_0, %c0_i32_1 : i32, i32, i32
  }
  func.func @transform_15(%arg0: i32, %arg1: memref<2x8xi32, #tpu.memory_space<smem>>) -> (i32, i32, i32) {
    %c0_i32 = arith.constant 0 : i32
    %c0_i32_0 = arith.constant 0 : i32
    %c0_i32_1 = arith.constant 0 : i32
    %c0_i32_2 = arith.constant 0 : i32
    return %c0_i32, %c0_i32_0, %c0_i32_1 : i32, i32, i32
  }
  func.func @transform_16(%arg0: i32, %arg1: memref<2x8xi32, #tpu.memory_space<smem>>) -> (i32, i32) {
    %c0_i32 = arith.constant 0 : i32
    %c0_i32_0 = arith.constant 0 : i32
    %c0_i32_1 = arith.constant 0 : i32
    return %c0_i32, %c0_i32_0 : i32, i32
  }
  func.func @transform_17(%arg0: i32, %arg1: memref<2x8xi32, #tpu.memory_space<smem>>) -> (i32, i32) {
    %c0_i32 = arith.constant 0 : i32
    %c0_i32_0 = arith.constant 0 : i32
    %c0_i32_1 = arith.constant 0 : i32
    return %c0_i32, %c0_i32_0 : i32, i32
  }
  func.func @transform_18(%arg0: i32, %arg1: memref<2x8xi32, #tpu.memory_space<smem>>) -> (i32, i32) {
    %c0_i32 = arith.constant 0 : i32
    %c0_i32_0 = arith.constant 0 : i32
    %c0_i32_1 = arith.constant 0 : i32
    return %c0_i32, %c0_i32_0 : i32, i32
  }
  func.func @transform_19(%arg0: i32, %arg1: memref<2x8xi32, #tpu.memory_space<smem>>) -> (i32, i32) {
    %c0_i32 = arith.constant 0 : i32
    %c0_i32_0 = arith.constant 0 : i32
    %c0_i32_1 = arith.constant 0 : i32
    return %c0_i32, %c0_i32_0 : i32, i32
  }
  func.func @transform_20(%arg0: i32, %arg1: memref<2x8xi32, #tpu.memory_space<smem>>) -> (i32, i32) {
    %c0_i32 = arith.constant 0 : i32
    %c0_i32_0 = arith.constant 0 : i32
    %c0_i32_1 = arith.constant 0 : i32
    return %c0_i32, %c0_i32_0 : i32, i32
  }
}

</mosaic_0001>

<bundles_post_ra>
// kernel: forward.1
= control target key start
LH: loop header
LB: loop body
LE: loop exit
PB: predicated region body
PF: predicated region fallthrough
CT: control target
= control target key end

     0   :  { %s1929_s27 = smov [#allocation4]   ;;  %s2604_s0 = inlined_call_operand.vmem [shape: s32[2,8], index: 0, kind: input, shape index: {}]   ;;  %s2605_s1 = inlined_call_operand.vmem [shape: f32[100,1,32], index: 1, kind: input, shape index: {}]   ;;  %s2606_s2 = inlined_call_operand.vmem [shape: f32[8,32], index: 2, kind: input, shape index: {}]   ;;  %s2607_s3 = inlined_call_operand.vmem [shape: f32[1,32], index: 3, kind: input, shape index: {}]   ;;  %s2608_s4 = inlined_call_operand.vmem [shape: f32[1,32], index: 4, kind: input, shape index: {}]   ;;  %s2609_s5 = inlined_call_operand.vmem [shape: f32[2,32,96], index: 5, kind: input, shape index: {}]   ;;  %s2610_s6 = inlined_call_operand.vmem [shape: f32[2,1,96], index: 6, kind: input, shape index: {}]   ;;  %s2611_s7 = inlined_call_operand.vmem [shape: f32[2,32,32], index: 7, kind: input, shape index: {}]   ;;  %s2612_s8 = inlined_call_operand.vmem [shape: f32[2,1,32], index: 8, kind: input, shape index: {}]   ;;  %s2613_s9 = inlined_call_operand.vmem [shape: f32[2,1,32], index: 9, kind: input, shape index: {}]   ;;  %s2614_s10 = inlined_call_operand.vmem [shape: f32[2,1,32], index: 10, kind: input, shape index: {}]   ;;  %s2615_s11 = inlined_call_operand.vmem [shape: f32[2,32,64], index: 11, kind: input, shape index: {}]   ;;  %s2616_s12 = inlined_call_operand.vmem [shape: f32[2,1,64], index: 12, kind: input, shape index: {}]   ;;  %s2617_s13 = inlined_call_operand.vmem [shape: f32[2,64,32], index: 13, kind: input, shape index: {}]   ;;  %s2618_s14 = inlined_call_operand.vmem [shape: f32[2,1,32], index: 14, kind: input, shape index: {}]   ;;  %s2619_s15 = inlined_call_operand.vmem [shape: f32[2,1,32], index: 15, kind: input, shape index: {}]   ;;  %s2620_s16 = inlined_call_operand.vmem [shape: f32[2,1,32], index: 16, kind: input, shape index: {}]   ;;  %s2621_s17 = inlined_call_operand.vmem [shape: f32[32,128], index: 17, kind: input, shape index: {}]   ;;  %s2622_s18 = inlined_call_operand.vmem [shape: f32[1,128], index: 18, kind: input, shape index: {}]   ;;  %s2623_s19 = inlined_call_operand.vmem [shape: s32[16,1], index: 19, kind: input, shape index: {}]   ;;  %s2624_s20 = inlined_call_operand.vmem [shape: f32[16,128], index: 20, kind: output, shape index: {0}]   ;;  %s2625_s21 = inlined_call_operand.hbm [shape: f32[1,1], index: 21, kind: output, shape index: {1}]  }
   0x1   :  { %2633 = sst [smem:[#allocation9_spill]] %s2604_s0 }
   0x2   :  { %2634 = sst [smem:[#allocation10_spill]] %s2605_s1 }
   0x3   :  { %2635 = sst [smem:[#allocation11_spill]] %s2606_s2 }
   0x4   :  { %2636 = sst [smem:[#allocation12_spill]] %s2607_s3 }
   0x5   :  { %2637 = sst [smem:[#allocation13_spill]] %s2608_s4 }
   0x6   :  { %2638 = sst [smem:[#allocation14_spill]] %s2609_s5 }
   0x7   :  { %2639 = sst [smem:[#allocation15_spill]] %s2619_s15 }
   0x8   :  { %2640 = sst [smem:[#allocation16_spill]] %s2621_s17 }
   0x9   :  { %2641 = sst [smem:[#allocation17_spill]] %s2622_s18 }
   0xa   :  { %2642 = sst [smem:[#allocation18_spill]] %s2623_s19 }
   0xb   :  { %2643 = sst [smem:[#allocation19_spill]] %s2624_s20 }
   0xc   :  { %2644 = sst [smem:[#allocation20_spill]] %s2625_s21 }
   0xd   :  { %s2645_s26 = sld [smem:[#allocation9_spill]] }
  0x13   :  { %s28_s15 = sshll.u32 %s2645_s26, 4  ;;  %s29_s15 = int_to_ptr.vmem [resolvable:$true] %s28_s15 }
  0x14   :  { %31 = dma.vmem_to_smem %s29_s15, 32, %s1929_s27, [#allocation3] }
  0x15   :  { %1925 = dma.done.wait [#allocation3], 32 }
  0x16   :  { %1926 = vsyncadd [#allocation3], 4294967264 }
  0x17   :  { %34 = sfence }
  0x18   :  { %s74_s3 = sld [smem:[#allocation4]]  ;;  %vm79_vm0 = vcmask 253952   ;;  %vm175_vm1 = vcmask 261120  }
  0x19   :  { %s1691_s28 = sld [smem:[#allocation4 + $0x1]] }
  0x1a   :  { %s1692_s29 = sld [smem:[#allocation4 + $0x2]] }
  0x1b   :  { %s1693_s0 = sld [smem:[#allocation4 + $0x3]] }
  0x1c   :  { %s2646_s5 = sld [smem:[#allocation11_spill]] }
  0x1d   :  { %s2055_s22 = sld [smem:[#allocation4 + $0x4]] }
  0x1e   :  { %s2060_s24 = sld [smem:[#allocation4 + $0x5]] }
  0x1f   :  { %s2647_s25 = sld [smem:[#allocation10_spill]] }
  0x20   :  { %s2071_s30 = sld [smem:[#allocation4 + $0x6]] }
  0x21   :  { %s2087_s18 = sld [smem:[#allocation4 + $0x80]] }
  0x22   :  { %v77_v0 = vld [vmem:[%s2646_s5] sm:$0x1]  ;;  %v84_v1 = vld [vmem:[%s2646_s5 + $0x1] sm:$0x1]  ;;  %v90_v2 = vld [vmem:[%s2646_s5 + $0x2] sm:$0x1] }
  0x23   :  { %v96_v3 = vld [vmem:[%s2646_s5 + $0x3] sm:$0x1]  ;;  %v102_v5 = vld [vmem:[%s2646_s5 + $0x4] sm:$0x1]  ;;  %v108_v8 = vld [vmem:[%s2646_s5 + $0x5] sm:$0x1] }
  0x24   :  { %v114_v11 = vld [vmem:[%s2646_s5 + $0x6] sm:$0x1]  ;;  %s2095_s23 = sld [smem:[#allocation4 + $0x81]]  ;;  %v120_v14 = vld [vmem:[%s2646_s5 + $0x7] sm:$0x1] }
  0x25   :  { %s75_s26 = scalar_lea.vmem %s2647_s25, %s74_s3  ;;  %s82_s1 = scalar_lea.vmem %s2647_s25, %s1691_s28  ;;  %v126_v17 = vld [vmem:[%s2646_s5] sm:$0x1]  ;;  %v132_v20 = vld [vmem:[%s2646_s5 + $0x1] sm:$0x1]  ;;  %v138_v23 = vld [vmem:[%s2646_s5 + $0x2] sm:$0x1] }
  0x26   :  { %v76_v4 = vld [vmem:[%s75_s26] sm:$0x1]  ;;  %s2079_s3 = sld [smem:[#allocation4 + $0x7]]  ;;  %s88_s20 = scalar_lea.vmem %s2647_s25, %s1692_s29  ;;  %v144_v26 = vld [vmem:[%s2646_s5 + $0x3] sm:$0x1] }
  0x27   :  { %v78_v6 = vadd.f32 %v77_v0, %v76_v4  ;;  %v83_v7 = vld [vmem:[%s82_s1] sm:$0x1]  ;;  %s94_s28 = scalar_lea.vmem %s2647_s25, %s1693_s0  ;;  %s100_s21 = scalar_lea.vmem %s2647_s25, %s2055_s22  ;;  %v150_v29 = vld [vmem:[%s2646_s5 + $0x4] sm:$0x1]  ;;  %v156_v32 = vld [vmem:[%s2646_s5 + $0x5] sm:$0x1] }
  0x28   :  { %v85_v9 = vadd.f32 %v84_v1, %v83_v7  ;;  %v89_v10 = vld [vmem:[%s88_s20] sm:$0x1]  ;;  %s2105_s0 = sld [smem:[#allocation4 + $0x82]]  ;;  %s106_s17 = scalar_lea.vmem %s2647_s25, %s2060_s24  ;;  %v162_v35 = vld [vmem:[%s2646_s5 + $0x6] sm:$0x1] }
  0x29   :  { %80 = vst.msk [vmem:[#allocation2] sm:$0x1] %vm79_vm0, %v78_v6  ;;  %v91_v12 = vadd.f32 %v90_v2, %v89_v10  ;;  %v95_v13 = vld [vmem:[%s94_s28] sm:$0x1]  ;;  %s2115_s22 = sld [smem:[#allocation4 + $0x83]]  ;;  %s112_s29 = scalar_lea.vmem %s2647_s25, %s2071_s30 }
  0x2a   :  { %86 = vst.msk [vmem:[#allocation2 + $0x1] sm:$0x1] %vm79_vm0, %v85_v9  ;;  %v97_v15 = vadd.f32 %v96_v3, %v95_v13  ;;  %v101_v16 = vld [vmem:[%s100_s21] sm:$0x1]  ;;  %s2125_s24 = sld [smem:[#allocation4 + $0x84]]  ;;  %s124_s26 = scalar_lea.vmem %s2647_s25, %s2087_s18 }
  0x2b   :  { %92 = vst.msk [vmem:[#allocation2 + $0x2] sm:$0x1] %vm79_vm0, %v91_v12  ;;  %v103_v18 = vadd.f32 %v102_v5, %v101_v16  ;;  %v107_v19 = vld [vmem:[%s106_s17] sm:$0x1]  ;;  %s2135_s30 = sld [smem:[#allocation4 + $0x85]]  ;;  %s130_s15 = scalar_lea.vmem %s2647_s25, %s2095_s23 }
  0x2c   :  { %98 = vst.msk [vmem:[#allocation2 + $0x3] sm:$0x1] %vm79_vm0, %v97_v15  ;;  %v109_v21 = vadd.f32 %v108_v8, %v107_v19  ;;  %v113_v22 = vld [vmem:[%s112_s29] sm:$0x1]  ;;  %s118_s2 = scalar_lea.vmem %s2647_s25, %s2079_s3  ;;  %s2145_s3 = sld [smem:[#allocation4 + $0x86]] }
  0x2d   :  { %104 = vst.msk [vmem:[#allocation2 + $0x4] sm:$0x1] %vm79_vm0, %v103_v18  ;;  %v115_v24 = vadd.f32 %v114_v11, %v113_v22  ;;  %v119_v25 = vld [vmem:[%s118_s2] sm:$0x1]  ;;  %s2155_s18 = sld [smem:[#allocation4 + $0x87]] }
  0x2e   :  { %110 = vst.msk [vmem:[#allocation2 + $0x5] sm:$0x1] %vm79_vm0, %v109_v21  ;;  %v121_v27 = vadd.f32 %v120_v14, %v119_v25  ;;  %v125_v28 = vld [vmem:[%s124_s26] sm:$0x1]  ;;  %s136_s19 = scalar_lea.vmem %s2647_s25, %s2105_s0  ;;  %v168_v38 = vld [vmem:[%s2646_s5 + $0x7] sm:$0x1] }
  0x2f   :  { %116 = vst.msk [vmem:[#allocation2 + $0x6] sm:$0x1] %vm79_vm0, %v115_v24  ;;  %v127_v30 = vadd.f32 %v126_v17, %v125_v28  ;;  %v131_v31 = vld [vmem:[%s130_s15] sm:$0x1]  ;;  %s142_s29 = scalar_lea.vmem %s2647_s25, %s2115_s22 }
  0x30   :  { %122 = vst.msk [vmem:[#allocation2 + $0x7] sm:$0x1] %vm79_vm0, %v121_v27  ;;  %v133_v33 = vadd.f32 %v132_v20, %v131_v31  ;;  %v137_v34 = vld [vmem:[%s136_s19] sm:$0x1]  ;;  %s148_s20 = scalar_lea.vmem %s2647_s25, %s2125_s24 }
  0x31   :  { %128 = vst.msk [vmem:[#allocation2 + $0x8] sm:$0x1] %vm79_vm0, %v127_v30  ;;  %v139_v36 = vadd.f32 %v138_v23, %v137_v34  ;;  %v143_v37 = vld [vmem:[%s142_s29] sm:$0x1]  ;;  %s154_s19 = scalar_lea.vmem %s2647_s25, %s2135_s30 }
  0x32   :  { %134 = vst.msk [vmem:[#allocation2 + $0x9] sm:$0x1] %vm79_vm0, %v133_v33  ;;  %v145_v39 = vadd.f32 %v144_v26, %v143_v37  ;;  %v149_v40 = vld [vmem:[%s148_s20] sm:$0x1]  ;;  %s160_s24 = scalar_lea.vmem %s2647_s25, %s2145_s3 }
  0x33   :  { %140 = vst.msk [vmem:[#allocation2 + $0xa] sm:$0x1] %vm79_vm0, %v139_v36  ;;  %v151_v41 = vadd.f32 %v150_v29, %v149_v40  ;;  %v155_v42 = vld [vmem:[%s154_s19] sm:$0x1]  ;;  %s166_s4 = scalar_lea.vmem %s2647_s25, %s2155_s18 }
  0x34   :  { %146 = vst.msk [vmem:[#allocation2 + $0xb] sm:$0x1] %vm79_vm0, %v145_v39  ;;  %v157_v43 = vadd.f32 %v156_v32, %v155_v42  ;;  %v161_v44 = vld [vmem:[%s160_s24] sm:$0x1] }
  0x35   :  { %152 = vst.msk [vmem:[#allocation2 + $0xc] sm:$0x1] %vm79_vm0, %v151_v41  ;;  %v163_v45 = vadd.f32 %v162_v35, %v161_v44  ;;  %v167_v46 = vld [vmem:[%s166_s4] sm:$0x1] }
  0x36   :  { %158 = vst.msk [vmem:[#allocation2 + $0xd] sm:$0x1] %vm79_vm0, %v157_v43  ;;  %v169_v47 = vadd.f32 %v168_v38, %v167_v46 }
  0x37   :  { %v171_v48 = vld [vmem:[#allocation2] sm:$0xff]  ;;  %164 = vst.msk [vmem:[#allocation2 + $0xe] sm:$0x1] %vm79_vm0, %v163_v45 }
  0x38   :  { %v176_v49 = vsel %vm175_vm1, %v171_v48, 0.0  ;;  %170 = vst.msk [vmem:[#allocation2 + $0xf] sm:$0x1] %vm79_vm0, %v169_v47 }
  0x39   :  { %177 = vadd.xlane.f32.xlu0 %v176_v49 }
  0x3a   :  { %35 = vsyncpa [#allocation6], 0  ;;  %v1930_v52 = vmov 32.0   ;;  %s2648_s3 = sld [smem:[#allocation14_spill]]  ;;  %v1800_v37 = vld [vmem:[%s2610_s6] ss:$0 sm:$0xff] }
  0x3b   :  { %1817 = vrcp.f32 %v1930_v52  ;;  %s2649_s27 = sld [smem:[#allocation12_spill]]  ;;  %s1931_s24 = smov 80   ;;  %vm282_vm9 = vcmask 130048   ;;  %vm336_vm10 = vcmask 64512  }
  0x3c   :  { %s2650_s19 = sld [smem:[#allocation13_spill]]  ;;  %s1932_s5 = smov 96  }
  0x3d   :  { %s1933_s23 = smov 112   ;;  %s1934_s4 = smov 64  }
  0x3e   :  { %s1935_s25 = smov 48   ;;  %s2651_s15 = sld [smem:[#allocation15_spill]] }
  0x3f   :  { %v172_v50 = vld [vmem:[#allocation2 + $0x8] sm:$0xff]  ;;  %s2652_s1 = sld [smem:[#allocation16_spill]]  ;;  %s1938_s30 = smov [#allocation5]  }
  0x40   :  { %v179_v51 = vsel %vm175_vm1, %v172_v50, 0.0  ;;  %v240_v5 = vld [vmem:[%s2648_s3 + $0x18] sm:$0xff]  ;;  %v239_v6 = vld [vmem:[%s2648_s3 + $0x10] sm:$0xff]  ;;  %v238_v7 = vld [vmem:[%s2648_s3 + $0x8] sm:$0xff]  ;;  %s2655_s17 = sld [smem:[#allocation19_spill]]  ;;  %s1662_s18 = sshll.u32 %s1938_s30, 4  ;;  %s1663_s18 = int_to_ptr.vmem [resolvable:$true] %s1662_s18 }
  0x41   :  { %180 = vadd.xlane.f32.xlu0 %v179_v51  ;;  %v1818_v53 = vpop.eup %1817  ;;  %263 = vmatpush.msra.mxu0 %v240_v5  ;;  %v237_v8 = vld [vmem:[%s2648_s3] sm:$0xff] }
  0x42   :  { %v183_v54 = vmul.f32 32.0, %v1818_v53  ;;  %vm187_vm2 = vweird.f32 %v1818_v53  ;;  %v1798_v23 = vld [vmem:[%s2649_s27] ss:$0 sm:$0xff]  ;;  %s2653_s27 = sld [smem:[#allocation18_spill]] }
  0x43   :  { %264 = vmatpush.msra.mxu0 %v239_v6  ;;  %v1799_v27 = vld [vmem:[%s2650_s19] ss:$0 sm:$0xff] }
  0x44   :  { %v184_v55 = vsub.f32 1.0, %v183_v54 }
  0x45   :  { %265 = vmatpush.msra.mxu0 %v238_v7 }
  0x46   :  { %v185_v56 = vmul.f32 %v1818_v53, %v184_v55 }
  0x47   :  { %266 = vmatpush.msra.mxu0 %v237_v8 }
  0x48   :  { %v186_v57 = vadd.f32 %v1818_v53, %v185_v56 }
  0x4a   :  { %v2202_v58 = vsel %vm187_vm2, %v1818_v53, %v186_v57 }
  0xac   :  { %v178_v59 = vpop.xlane.xlu0 %177 }
  0xad   :  { %v189_v60 = vmul.f32 %v2202_v58, %v178_v59 }
  0xaf   :  { %v191_v61 = vsub.f32 %v171_v48, %v189_v60 }
  0xb1   :  { %v193_v62 = vmul.f32 %v191_v61, %v191_v61 }
  0xb3   :  { %v195_v63 = vsel %vm175_vm1, %v193_v62, 0.0 }
  0xb4   :  { %196 = vadd.xlane.f32.xlu1 %v195_v63  ;;  %v181_v0 = vpop.xlane.xlu0 %180 }
  0xb5   :  { %v190_v1 = vmul.f32 %v2202_v58, %v181_v0 }
  0xb7   :  { %v192_v2 = vsub.f32 %v172_v50, %v190_v1 }
  0xb9   :  { %v194_v3 = vmul.f32 %v192_v2, %v192_v2 }
  0xbb   :  { %v198_v4 = vsel %vm175_vm1, %v194_v3, 0.0 }
  0xbc   :  { %199 = vadd.xlane.f32.xlu1 %v198_v4 }
 0x127   :  { %v197_v9 = vpop.xlane.xlu1 %196 }
 0x128   :  { %v201_v10 = vmul.f32 %v197_v9, %v2202_v58 }
 0x12a   :  { %v203_v11 = vadd.f32 1e-12, %v201_v10 }
 0x12c   :  { %1819 = vrsqrt.f32 %v203_v11  ;;  %vm211_vm4 = vweird.f32 %v203_v11 }
 0x12f   :  { %v200_v12 = vpop.xlane.xlu1 %199 }
 0x130   :  { %v202_v13 = vmul.f32 %v200_v12, %v2202_v58 }
 0x132   :  { %v1820_v14 = vpop.eup %1819  ;;  %v204_v15 = vadd.f32 1e-12, %v202_v13 }
 0x133   :  { %v206_v16 = vmul.f32 %v1820_v14, %v203_v11  ;;  %vm212_vm3 = vweird.f32 %v1820_v14 }
 0x134   :  { %1821 = vrsqrt.f32 %v204_v15  ;;  %vm213_vm5 = vmor %vm211_vm4, %vm212_vm3  ;;  %vm221_vm6 = vweird.f32 %v204_v15 }
 0x135   :  { %v207_v17 = vmul.f32 %v1820_v14, %v206_v16 }
 0x137   :  { %v208_v18 = vmul.f32 0.5, %v207_v17 }
 0x139   :  { %v209_v19 = vsub.f32 1.5, %v208_v18 }
 0x13a   :  { %v1822_v20 = vpop.eup %1821 }
 0x13b   :  { %v210_v21 = vmul.f32 %v1820_v14, %v209_v19  ;;  %v216_v22 = vmul.f32 %v1822_v20, %v204_v15  ;;  %vm222_vm7 = vweird.f32 %v1822_v20 }
 0x13c   :  { %vm223_vm8 = vmor %vm221_vm6, %vm222_vm7 }
 0x13d   :  { %v214_v24 = vsel %vm213_vm5, %v1820_v14, %v210_v21  ;;  %v217_v25 = vmul.f32 %v1822_v20, %v216_v22  ;;  %v275_v22 = vld [vmem:[%s2611_s7 + $0x8] sm:$0xff] }
 0x13e   :  { %v225_v26 = vmul.f32 %v214_v24, %v191_v61 }
 0x13f   :  { %v218_v28 = vmul.f32 0.5, %v217_v25 }
 0x140   :  { %v230_v29 = vmul.f32 %v1798_v23, %v225_v26 }
 0x141   :  { %v219_v30 = vsub.f32 1.5, %v218_v28 }
 0x142   :  { %v2228_v31 = vadd.f32 %v1799_v27, %v230_v29 }
 0x143   :  { %v220_v32 = vmul.f32 %v1822_v20, %v219_v30 }
 0x144   :  { %1706 = vmatmul.msk.f32.vlgmr.msra.gmra.mxu0 %vm175_vm1, %v2228_v31 }
 0x145   :  { %v224_v33 = vsel %vm223_vm8, %v1822_v20, %v220_v32 }
 0x146   :  { %v226_v34 = vmul.f32 %v224_v33, %v192_v2 }
 0x148   :  { %v231_v35 = vmul.f32 %v1798_v23, %v226_v34 }
 0x14a   :  { %v2232_v36 = vadd.f32 %v1799_v27, %v231_v35 }
 0x14c   :  { %1707 = vmatmul.msk.f32.gmra.mxu0 %vm175_vm1, %v2232_v36 }
 0x1c1   :  { %v268_v38 = vpop.f32.mrf.mxu0 }
 0x1c2   :  { %v2239_v39 = vadd.f32 %v1800_v37, %v268_v38 }
 0x1c4   :  { %473 = vrot.lane.b32.xlu0 %v2239_v39, %s1931_s24  ;;  %280 = vrot.lane.b32.xlu2 %v2239_v39, %s1932_s5 }
 0x1c5   :  { %471 = vrot.lane.b32.xlu1 %v2239_v39, %s1933_s23 }
 0x1c9   :  { %v271_v40 = vpop.f32.mrf.mxu0 }
 0x1ca   :  { %v272_v41 = vadd.f32 %v1800_v37, %v271_v40 }
 0x1cc   :  { %308 = vrot.lane.b32.xlu2 %v272_v41, %s1932_s5 }
 0x21e   :  { %v281_v42 = vpop.permute.xlu2 %280 }
 0x21f   :  { %1708 = vmatpush.xpose.msk.msra.mxu1 %vm282_vm9, %v281_v42 }
 0x222   :  { %1709 = vmatmul.msk.f32.vlgmr.msra.gmra.mxu1 %vm282_vm9, %v2239_v39 }
 0x223   :  { %457 = vmatpush.msrb.mxu1 %v275_v22 }
 0x226   :  { %v309_v43 = vpop.permute.xlu2 %308 }
 0x227   :  { %1710 = vmatpush.xpose.msk.msra.mxu2 %vm282_vm9, %v309_v43 }
 0x22a   :  { %1711 = vmatmul.msk.f32.vlgmr.msra.gmra.mxu2 %vm282_vm9, %v272_v41 }
 0x236   :  { %v474_v44 = vpop.permute.xlu0 %473 }
 0x237   :  { %1716 = vmatpush.xpose.msk.msrb.mxu2 %vm282_vm9, %v474_v44  ;;  %v472_v45 = vpop.permute.xlu1 %471 }
 0x23a   :  { %1717 = vmatmul.msk.f32.vlgmr.msrb.gmra.mxu2 %vm282_vm9, %v472_v45 }
 0x29f   :  { %v304_v46 = vpop.f32.mrf.mxu1 }
 0x2a0   :  { %v334_v47 = vmul.f32 0.25, %v304_v46 }
 0x2a2   :  { %v337_v48 = vsel %vm336_vm10, %v334_v47, -inf }
 0x2a3   :  { %338 = vmax.xlane.f32.xlu2 %v337_v48 }
 0x2ad   :  { %v331_v49 = vpop.f32.mrf.mxu2 }
 0x2ae   :  { %v335_v50 = vmul.f32 0.25, %v331_v49 }
 0x2b0   :  { %v340_v51 = vsel %vm336_vm10, %v335_v50, -inf }
 0x2b1   :  { %341 = vmax.xlane.f32.xlu0 %v340_v51 }
 0x2bb   :  { %411 = vrot.lane.b32.xlu2 %v272_v41, %s1934_s4 }
 0x2bd   :  { %v496_v52 = vpop.f32.mrf.mxu2 }
 0x2be   :  { %v527_v53 = vmul.f32 0.25, %v496_v52  ;;  %v274_v52 = vld [vmem:[%s2611_s7] sm:$0xff] }
 0x2bf   :  { %458 = vmatpush.msrb.mxu1 %v274_v52  ;;  %v777_v52 = vld [vmem:[%s2617_s13 + $0x20] sm:$0xff] }
 0x2c0   :  { %v529_v54 = vsel %vm336_vm10, %v527_v53, -inf }
 0x2c1   :  { %530 = vmax.xlane.f32.xlu1 %v529_v54  ;;  %v276_v54 = vld [vmem:[%s2611_s7 + $0x10] sm:$0xff] }
 0x2c5   :  { %385 = vrot.lane.b32.xlu0 %v2239_v39, %s1934_s4 }
 0x2cd   :  { %499 = vrot.lane.b32.xlu0 %v272_v41, %s1933_s23 }
 0x2da   :  { %501 = vrot.lane.b32.xlu1 %v272_v41, %s1931_s24 }
 0x316   :  { %v339_v55 = vpop.xlane.xlu2 %338 }
 0x317   :  { %v343_v56 = vsub.f32 %v334_v47, %v339_v55 }
 0x319   :  { %v345_v57 = vmul.f32 1.442695, %v343_v56 }
 0x31b   :  { %1823 = vpow2.f32 %v345_v57 }
 0x31e   :  { %v412_v6 = vpop.permute.xlu2 %411 }
 0x321   :  { %v1824_v59 = vpop.eup %1823 }
 0x322   :  { %v349_v60 = vsel %vm336_vm10, %v1824_v59, 0.0 }
 0x323   :  { %350 = vadd.xlane.f32.xlu2 %v349_v60 }
 0x324   :  { %v342_v61 = vpop.xlane.xlu0 %341 }
 0x325   :  { %v344_v62 = vsub.f32 %v335_v50, %v342_v61 }
 0x327   :  { %v347_v63 = vmul.f32 1.442695, %v344_v62 }
 0x329   :  { %1825 = vpow2.f32 %v347_v63 }
 0x32f   :  { %v1826_v0 = vpop.eup %1825 }
 0x330   :  { %v352_v1 = vsel %vm336_vm10, %v1826_v0, 0.0 }
 0x331   :  { %353 = vadd.xlane.f32.xlu2 %v352_v1 }
 0x334   :  { %v531_v2 = vpop.xlane.xlu1 %530 }
 0x335   :  { %v535_v3 = vsub.f32 %v527_v53, %v531_v2  ;;  %v277_v53 = vld [vmem:[%s2611_s7 + $0x18] sm:$0xff] }
 0x337   :  { %v537_v4 = vmul.f32 1.442695, %v535_v3  ;;  %v386_v5 = vpop.permute.xlu0 %385  ;;  %v2298_v3 = vld [vmem:[%s2612_s8] ss:$0 sm:$0xff] }
 0x338   :  { %406 = vmatpush.msra.mxu3 %v386_v5 }
 0x339   :  { %1827 = vpow2.f32 %v537_v4 }
 0x33a   :  { %432 = vmatpush.msrb.mxu3 %v412_v6 }
 0x33f   :  { %v2265_v7 = vpop.eup %1827  ;;  %v500_v43 = vpop.permute.xlu0 %499 }
 0x340   :  { %v541_v8 = vsel %vm336_vm10, %v2265_v7, 0.0 }
 0x341   :  { %542 = vadd.xlane.f32.xlu2 %v541_v8 }
 0x34c   :  { %v502_v23 = vpop.permute.xlu1 %501 }
 0x359   :  { %577 = vrot.lane.b32.xlu2 %v2239_v39, %s1935_s25 }
 0x361   :  { %603 = vrot.lane.b32.xlu2 %v272_v41, %s1935_s25 }
 0x396   :  { %v351_v9 = vpop.xlane.xlu2 %350 }
 0x397   :  { %1829 = vrcp.f32 %v351_v9  ;;  %v366_v13 = vand.u32 2147483648, %v351_v9  ;;  %v364_v15 = vand.u32 2147483647, %v351_v9  ;;  %vm360_vm12 = vweird.f32 %v351_v9 }
 0x399   :  { %v367_v18 = vor.u32 1.1754944e-38, %v366_v13  ;;  %vm365_vm14 = vcmp.eq.f32.partialorder %v364_v15, 8.507059e+37 }
 0x39d   :  { %v1830_v10 = vpop.eup %1829 }
 0x39e   :  { %v356_v11 = vmul.f32 %v1830_v10, %v351_v9  ;;  %vm361_vm11 = vweird.f32 %v1830_v10 }
 0x39f   :  { %vm362_vm13 = vmor %vm360_vm12, %vm361_vm11 }
 0x3a0   :  { %v357_v12 = vsub.f32 1.0, %v356_v11 }
 0x3a2   :  { %v358_v14 = vmul.f32 %v1830_v10, %v357_v12 }
 0x3a4   :  { %v354_v16 = vpop.xlane.xlu2 %353  ;;  %v359_v17 = vadd.f32 %v1830_v10, %v358_v14 }
 0x3a5   :  { %1831 = vrcp.f32 %v354_v16  ;;  %v381_v28 = vand.u32 2147483648, %v354_v16  ;;  %v379_v29 = vand.u32 2147483647, %v354_v16  ;;  %vm375_vm0 = vweird.f32 %v354_v16 }
 0x3a6   :  { %v363_v19 = vsel %vm362_vm13, %v1830_v10, %v359_v17 }
 0x3a7   :  { %v368_v20 = vsel %vm365_vm14, %v367_v18, %v363_v19  ;;  %v382_v32 = vor.u32 1.1754944e-38, %v381_v28  ;;  %vm380_vm3 = vcmp.eq.f32.partialorder %v379_v29, 8.507059e+37  ;;  %v719_v28 = vld [vmem:[%s2615_s11 + $0x8] sm:$0xff]  ;;  %v718_v29 = vld [vmem:[%s2615_s11] sm:$0xff] }
 0x3a8   :  { %v369_v21 = vmul.f32 %v1824_v59, %v368_v20 }
 0x3aa   :  { %1712 = vmatmul.msk.f32.vlgmr.msra.gmra.mxu3 %vm336_vm10, %v369_v21 }
 0x3ab   :  { %v1832_v24 = vpop.eup %1831  ;;  %1718 = vmatpush.xpose.msk.msra.mxu3 %vm282_vm9, %v502_v23 }
 0x3ac   :  { %v371_v25 = vmul.f32 %v1832_v24, %v354_v16  ;;  %vm376_vm15 = vweird.f32 %v1832_v24 }
 0x3ad   :  { %vm377_vm2 = vmor %vm375_vm0, %vm376_vm15 }
 0x3ae   :  { %v372_v26 = vsub.f32 1.0, %v371_v25 }
 0x3b0   :  { %v373_v27 = vmul.f32 %v1832_v24, %v372_v26  ;;  %v721_v26 = vld [vmem:[%s2615_s11 + $0x18] sm:$0xff] }
 0x3b1   :  { %744 = vmatpush.msra.mxu1 %v721_v26 }
 0x3b2   :  { %v374_v30 = vadd.f32 %v1832_v24, %v373_v27  ;;  %v720_v27 = vld [vmem:[%s2615_s11 + $0x10] sm:$0xff] }
 0x3b3   :  { %745 = vmatpush.msra.mxu1 %v720_v27 }
 0x3b4   :  { %v543_v33 = vpop.xlane.xlu2 %542  ;;  %v378_v34 = vsel %vm377_vm2, %v1832_v24, %v374_v30  ;;  %vm785_vm2 = vcmask 523264  }
 0x3b5   :  { %1833 = vrcp.f32 %v543_v33  ;;  %v383_v35 = vsel %vm380_vm3, %v382_v32, %v378_v34  ;;  %v558_v42 = vand.u32 2147483648, %v543_v33  ;;  %v556_v45 = vand.u32 2147483647, %v543_v33  ;;  %746 = vmatpush.msra.mxu1 %v719_v28 }
 0x3b6   :  { %v384_v37 = vmul.f32 %v1826_v0, %v383_v35  ;;  %vm552_vm5 = vweird.f32 %v543_v33 }
 0x3b7   :  { %v559_v47 = vor.u32 1.1754944e-38, %v558_v42  ;;  %vm557_vm7 = vcmp.eq.f32.partialorder %v556_v45, 8.507059e+37  ;;  %747 = vmatpush.msra.mxu1 %v718_v29  ;;  %v2323_v42 = vld [vmem:[%s2613_s9] ss:$0 sm:$0xff] }
 0x3b8   :  { %1713 = vmatmul.msk.f32.vlgmr.msrb.gmra.mxu3 %vm336_vm10, %v384_v37  ;;  %v2328_v45 = vld [vmem:[%s2614_s10] ss:$0 sm:$0xff] }
 0x3b9   :  { %649 = vmatpush.msrb.mxu3 %v277_v53 }
 0x3bb   :  { %v1834_v38 = vpop.eup %1833  ;;  %650 = vmatpush.msrb.mxu3 %v276_v54 }
 0x3bc   :  { %v548_v39 = vmul.f32 %v1834_v38, %v543_v33  ;;  %v578_v40 = vpop.permute.xlu2 %577  ;;  %vm553_vm4 = vweird.f32 %v1834_v38 }
 0x3bd   :  { %598 = vmatpush.msra.mxu2 %v578_v40  ;;  %vm554_vm6 = vmor %vm552_vm5, %vm553_vm4 }
 0x3be   :  { %v549_v41 = vsub.f32 1.0, %v548_v39 }
 0x3c0   :  { %v550_v44 = vmul.f32 %v1834_v38, %v549_v41  ;;  %1719 = vmatmul.msk.f32.vlgmr.msra.gmra.mxu3 %vm282_vm9, %v500_v43 }
 0x3c2   :  { %v551_v46 = vadd.f32 %v1834_v38, %v550_v44 }
 0x3c4   :  { %v555_v48 = vsel %vm554_vm6, %v1834_v38, %v551_v46  ;;  %v604_v49 = vpop.permute.xlu2 %603 }
 0x3c5   :  { %v560_v50 = vsel %vm557_vm7, %v559_v47, %v555_v48  ;;  %624 = vmatpush.msrb.mxu0 %v604_v49  ;;  %v780_v48 = vld [vmem:[%s2617_s13 + $0x38] sm:$0xff]  ;;  %v779_v49 = vld [vmem:[%s2617_s13 + $0x30] sm:$0xff] }
 0x3c6   :  { %v561_v51 = vmul.f32 %v2265_v7, %v560_v50  ;;  %800 = vmatpush.msrb.mxu2 %v780_v48  ;;  %v1728_v48 = vld [vmem:[%s2648_s3 + $0x20] sm:$0xff] }
 0x3c8   :  { %1720 = vmatmul.msk.f32.vlgmr.msra.gmra.mxu2 %vm336_vm10, %v561_v51  ;;  %v778_v51 = vld [vmem:[%s2617_s13 + $0x28] sm:$0xff] }
 0x3c9   :  { %801 = vmatpush.msrb.mxu2 %v779_v49 }
 0x3cb   :  { %802 = vmatpush.msrb.mxu2 %v778_v51 }
 0x3cd   :  { %803 = vmatpush.msrb.mxu2 %v777_v52 }
 0x42d   :  { %v408_v55 = vpop.f32.mrf.mxu3 }
 0x42e   :  { %1714 = vmatmul.msk.f32.vlgmr.msrb.gmra.mxu1 %vm282_vm9, %v408_v55  ;;  %v776_v55 = vld [vmem:[%s2617_s13 + $0x18] sm:$0xff] }
 0x42f   :  { %804 = vmatpush.msrb.mxu2 %v776_v55 }
 0x43b   :  { %v434_v56 = vpop.f32.mrf.mxu3 }
 0x43c   :  { %1715 = vmatmul.msk.f32.gmra.mxu1 %vm282_vm9, %v434_v56 }
 0x443   :  { %v524_v57 = vpop.f32.mrf.mxu3 }
 0x444   :  { %v528_v59 = vmul.f32 0.25, %v524_v57  ;;  %v775_v57 = vld [vmem:[%s2617_s13 + $0x10] sm:$0xff] }
 0x445   :  { %805 = vmatpush.msrb.mxu2 %v775_v57 }
 0x446   :  { %v532_v60 = vsel %vm336_vm10, %v528_v59, -inf }
 0x447   :  { %533 = vmax.xlane.f32.xlu0 %v532_v60  ;;  %v774_v60 = vld [vmem:[%s2617_s13 + $0x8] sm:$0xff] }
 0x448   :  { %806 = vmatpush.msrb.mxu2 %v774_v60 }
 0x44b   :  { %v600_v61 = vpop.f32.mrf.mxu2 }
 0x44c   :  { %1722 = vmatmul.msk.f32.vlgmr.msrb.gmra.mxu3 %vm282_vm9, %v600_v61 }
 0x4ab   :  { %v460_v4 = vpop.f32.mrf.mxu1 }
 0x4ac   :  { %v469_v5 = vadd.f32 %v2298_v3, %v460_v4 }
 0x4b9   :  { %v463_v50 = vpop.f32.mrf.mxu1 }
 0x4ba   :  { %v534_v62 = vpop.xlane.xlu0 %533  ;;  %v470_v53 = vadd.f32 %v2298_v3, %v463_v50 }
 0x4bb   :  { %v536_v63 = vsub.f32 %v528_v59, %v534_v62  ;;  %v773_v62 = vld [vmem:[%s2617_s13] sm:$0xff] }
 0x4bc   :  { %807 = vmatpush.msrb.mxu2 %v773_v62 }
 0x4bd   :  { %v539_v0 = vmul.f32 1.442695, %v536_v63  ;;  %v1804_v63 = vld [vmem:[%s2616_s12] ss:$0 sm:$0xff] }
 0x4bf   :  { %1835 = vpow2.f32 %v539_v0 }
 0x4c5   :  { %v1836_v1 = vpop.eup %1835 }
 0x4c6   :  { %v544_v2 = vsel %vm336_vm10, %v1836_v1, 0.0 }
 0x4c7   :  { %545 = vadd.xlane.f32.xlu1 %v544_v2 }
 0x4cf   :  { %v652_v6 = vpop.f32.mrf.mxu3 }
 0x4d0   :  { %v658_v7 = vadd.f32 %v652_v6, %v469_v5 }
 0x4d2   :  { %v660_v8 = vadd.f32 %v658_v7, %v2228_v31 }
 0x4d4   :  { %v664_v9 = vsel %vm175_vm1, %v660_v8, 0.0 }
 0x4d5   :  { %665 = vadd.xlane.f32.xlu2 %v664_v9 }
 0x53a   :  { %v546_v10 = vpop.xlane.xlu1 %545 }
 0x53b   :  { %1837 = vrcp.f32 %v546_v10  ;;  %v573_v14 = vand.u32 2147483648, %v546_v10  ;;  %v571_v16 = vand.u32 2147483647, %v546_v10  ;;  %vm567_vm11 = vweird.f32 %v546_v10 }
 0x53d   :  { %v574_v20 = vor.u32 1.1754944e-38, %v573_v14  ;;  %vm572_vm13 = vcmp.eq.f32.partialorder %v571_v16, 8.507059e+37 }
 0x541   :  { %v1838_v11 = vpop.eup %1837 }
 0x542   :  { %v563_v12 = vmul.f32 %v1838_v11, %v546_v10  ;;  %vm568_vm8 = vweird.f32 %v1838_v11 }
 0x543   :  { %vm569_vm12 = vmor %vm567_vm11, %vm568_vm8 }
 0x544   :  { %v564_v13 = vsub.f32 1.0, %v563_v12 }
 0x546   :  { %v565_v15 = vmul.f32 %v1838_v11, %v564_v13 }
 0x548   :  { %v666_v17 = vpop.xlane.xlu2 %665  ;;  %v566_v18 = vadd.f32 %v1838_v11, %v565_v15  ;;  %v2369_v15 = vld [vmem:[%s2618_s14] ss:$0 sm:$0xff] }
 0x549   :  { %v670_v19 = vmul.f32 %v666_v17, %v2202_v58 }
 0x54a   :  { %v570_v21 = vsel %vm569_vm12, %v1838_v11, %v566_v18 }
 0x54b   :  { %v672_v31 = vsub.f32 %v660_v8, %v670_v19  ;;  %v575_v22 = vsel %vm572_vm13, %v574_v20, %v570_v21 }
 0x54c   :  { %v576_v23 = vmul.f32 %v1836_v1, %v575_v22 }
 0x54d   :  { %v674_v24 = vmul.f32 %v672_v31, %v672_v31 }
 0x54e   :  { %1721 = vmatmul.msk.f32.vlgmr.msrb.gmra.mxu0 %vm336_vm10, %v576_v23 }
 0x54f   :  { %v676_v25 = vsel %vm175_vm1, %v674_v24, 0.0 }
 0x550   :  { %677 = vadd.xlane.f32.xlu0 %v676_v25 }
 0x5c3   :  { %v678_v30 = vpop.xlane.xlu0 %677 }
 0x5c4   :  { %v682_v32 = vmul.f32 %v678_v30, %v2202_v58 }
 0x5c6   :  { %v684_v33 = vadd.f32 1e-12, %v682_v32 }
 0x5c8   :  { %1839 = vrsqrt.f32 %v684_v33  ;;  %vm692_vm15 = vweird.f32 %v684_v33 }
 0x5cb   :  { %v626_v34 = vpop.f32.mrf.mxu0 }
 0x5cc   :  { %1723 = vmatmul.msk.f32.gmra.mxu3 %vm282_vm9, %v626_v34 }
 0x5ce   :  { %v1840_v35 = vpop.eup %1839 }
 0x5cf   :  { %v687_v37 = vmul.f32 %v1840_v35, %v684_v33  ;;  %vm693_vm14 = vweird.f32 %v1840_v35 }
 0x5d0   :  { %vm694_vm0 = vmor %vm692_vm15, %vm693_vm14 }
 0x5d1   :  { %v688_v38 = vmul.f32 %v1840_v35, %v687_v37 }
 0x5d3   :  { %v689_v39 = vmul.f32 0.5, %v688_v38 }
 0x5d5   :  { %v690_v40 = vsub.f32 1.5, %v689_v39 }
 0x5d7   :  { %v691_v41 = vmul.f32 %v1840_v35, %v690_v40 }
 0x5d9   :  { %v695_v43 = vsel %vm694_vm0, %v1840_v35, %v691_v41 }
 0x5da   :  { %v706_v44 = vmul.f32 %v695_v43, %v672_v31 }
 0x5dc   :  { %v711_v46 = vmul.f32 %v2323_v42, %v706_v44 }
 0x5de   :  { %v716_v47 = vadd.f32 %v2328_v45, %v711_v46 }
 0x5e0   :  { %1724 = vmatmul.msk.f32.vlgmr.msra.gmra.mxu1 %vm175_vm1, %v716_v47 }
 0x64f   :  { %v655_v54 = vpop.f32.mrf.mxu3 }
 0x650   :  { %v659_v56 = vadd.f32 %v655_v54, %v470_v53 }
 0x652   :  { %v661_v59 = vadd.f32 %v659_v56, %v2232_v36 }
 0x654   :  { %v667_v61 = vsel %vm175_vm1, %v661_v59, 0.0 }
 0x655   :  { %668 = vadd.xlane.f32.xlu1 %v667_v61 }
 0x65d   :  { %v749_v0 = vpop.f32.mrf.mxu1 }
 0x65e   :  { %v750_v36 = vadd.f32 %v1804_v63, %v749_v0  ;;  %v1806_v0 = vld [vmem:[%s2651_s15] ss:$0 sm:$0xff] }
 0x660   :  { %v755_v1 = vmul.f32 %v750_v36, %v750_v36 }
 0x662   :  { %v757_v2 = vmul.f32 %v755_v1, %v750_v36 }
 0x664   :  { %v759_v3 = vmul.f32 0.044715, %v757_v2  ;;  %v1807_v2 = vld [vmem:[%s2620_s16] ss:$0 sm:$0xff] }
 0x666   :  { %v761_v4 = vadd.f32 %v759_v3, %v750_v36 }
 0x668   :  { %v763_v5 = vmul.f32 0.7978846, %v761_v4 }
 0x66a   :  { %1841 = vtanh.f32 %v763_v5 }
 0x670   :  { %v1842_v6 = vpop.eup %1841 }
 0x671   :  { %v767_v7 = vadd.f32 1.0, %v1842_v6 }
 0x673   :  { %v769_v8 = vmul.f32 0.5, %v767_v7 }
 0x675   :  { %v771_v9 = vmul.f32 %v769_v8, %v750_v36 }
 0x677   :  { %1726 = vmatmul.msk.f32.vlgmr.msrb.gmra.mxu2 %vm785_vm2, %v771_v9  ;;  %v1808_v9 = vld [vmem:[%s2610_s6 + $0x1] ss:$0 sm:$0xff] }
 0x6c8   :  { %v669_v10 = vpop.xlane.xlu1 %668 }
 0x6c9   :  { %v671_v11 = vmul.f32 %v669_v10, %v2202_v58 }
 0x6cb   :  { %v673_v12 = vsub.f32 %v661_v59, %v671_v11 }
 0x6cd   :  { %v675_v13 = vmul.f32 %v673_v12, %v673_v12 }
 0x6cf   :  { %v679_v14 = vsel %vm175_vm1, %v675_v13, 0.0 }
 0x6d0   :  { %680 = vadd.xlane.f32.xlu0 %v679_v14 }
 0x6fa   :  { %v809_v16 = vpop.f32.mrf.mxu2 }
 0x6fb   :  { %v810_v17 = vadd.f32 %v2369_v15, %v809_v16 }
 0x6fd   :  { %v815_v18 = vadd.f32 %v810_v17, %v716_v47  ;;  %v1729_v47 = vld [vmem:[%s2648_s3 + $0x28] sm:$0xff] }
 0x6ff   :  { %v819_v19 = vsel %vm175_vm1, %v815_v18, 0.0 }
 0x700   :  { %820 = vadd.xlane.f32.xlu1 %v819_v19 }
 0x743   :  { %v681_v20 = vpop.xlane.xlu0 %680 }
 0x744   :  { %v683_v31 = vmul.f32 %v681_v20, %v2202_v58 }
 0x746   :  { %v685_v21 = vadd.f32 1e-12, %v683_v31 }
 0x748   :  { %1843 = vrsqrt.f32 %v685_v21  ;;  %vm702_vm4 = vweird.f32 %v685_v21 }
 0x74e   :  { %v1844_v22 = vpop.eup %1843 }
 0x74f   :  { %v697_v23 = vmul.f32 %v1844_v22, %v685_v21  ;;  %vm703_vm3 = vweird.f32 %v1844_v22 }
 0x750   :  { %vm704_vm5 = vmor %vm702_vm4, %vm703_vm3 }
 0x751   :  { %v698_v24 = vmul.f32 %v1844_v22, %v697_v23 }
 0x753   :  { %v699_v25 = vmul.f32 0.5, %v698_v24 }
 0x755   :  { %v700_v26 = vsub.f32 1.5, %v699_v25 }
 0x757   :  { %v701_v27 = vmul.f32 %v1844_v22, %v700_v26 }
 0x759   :  { %v705_v28 = vsel %vm704_vm5, %v1844_v22, %v701_v27 }
 0x75a   :  { %v707_v29 = vmul.f32 %v705_v28, %v673_v12 }
 0x75c   :  { %v712_v30 = vmul.f32 %v2323_v42, %v707_v29  ;;  %v1731_v42 = vld [vmem:[%s2648_s3 + $0x38] sm:$0xff] }
 0x75d   :  { %901 = vmatpush.msra.mxu0 %v1731_v42 }
 0x75e   :  { %v717_v32 = vadd.f32 %v2328_v45, %v712_v30  ;;  %v1730_v45 = vld [vmem:[%s2648_s3 + $0x30] sm:$0xff] }
 0x75f   :  { %902 = vmatpush.msra.mxu0 %v1730_v45 }
 0x760   :  { %1725 = vmatmul.msk.f32.gmra.mxu1 %vm175_vm1, %v717_v32 }
 0x761   :  { %903 = vmatpush.msra.mxu0 %v1729_v47 }
 0x763   :  { %904 = vmatpush.msra.mxu0 %v1728_v48 }
 0x773   :  { %v821_v33 = vpop.xlane.xlu1 %820 }
 0x774   :  { %v825_v34 = vmul.f32 %v821_v33, %v2202_v58 }
 0x776   :  { %v827_v35 = vsub.f32 %v815_v18, %v825_v34 }
 0x778   :  { %v829_v37 = vmul.f32 %v827_v35, %v827_v35 }
 0x77a   :  { %v831_v38 = vsel %vm175_vm1, %v829_v37, 0.0 }
 0x77b   :  { %832 = vadd.xlane.f32.xlu2 %v831_v38 }
 0x7dd   :  { %v752_v39 = vpop.f32.mrf.mxu1 }
 0x7de   :  { %v753_v40 = vadd.f32 %v1804_v63, %v752_v39 }
 0x7e0   :  { %v756_v41 = vmul.f32 %v753_v40, %v753_v40 }
 0x7e2   :  { %v758_v43 = vmul.f32 %v756_v41, %v753_v40 }
 0x7e4   :  { %v760_v44 = vmul.f32 0.044715, %v758_v43 }
 0x7e6   :  { %v762_v46 = vadd.f32 %v760_v44, %v753_v40 }
 0x7e8   :  { %v764_v49 = vmul.f32 0.7978846, %v762_v46 }
 0x7ea   :  { %1845 = vtanh.f32 %v764_v49 }
 0x7ee   :  { %v833_v50 = vpop.xlane.xlu2 %832 }
 0x7ef   :  { %v837_v51 = vmul.f32 %v833_v50, %v2202_v58 }
 0x7f0   :  { %v1846_v52 = vpop.eup %1845 }
 0x7f1   :  { %v839_v53 = vadd.f32 1e-12, %v837_v51  ;;  %v768_v54 = vadd.f32 1.0, %v1846_v52 }
 0x7f3   :  { %1847 = vrsqrt.f32 %v839_v53  ;;  %v770_v55 = vmul.f32 0.5, %v768_v54  ;;  %vm847_vm7 = vweird.f32 %v839_v53 }
 0x7f5   :  { %v772_v56 = vmul.f32 %v770_v55, %v753_v40 }
 0x7f7   :  { %1727 = vmatmul.msk.f32.gmra.mxu2 %vm785_vm2, %v772_v56 }
 0x7f9   :  { %v1848_v57 = vpop.eup %1847 }
 0x7fa   :  { %v842_v59 = vmul.f32 %v1848_v57, %v839_v53  ;;  %vm848_vm6 = vweird.f32 %v1848_v57 }
 0x7fb   :  { %vm849_vm8 = vmor %vm847_vm7, %vm848_vm6 }
 0x7fc   :  { %v843_v60 = vmul.f32 %v1848_v57, %v842_v59 }
 0x7fe   :  { %v844_v61 = vmul.f32 0.5, %v843_v60 }
 0x800   :  { %v845_v62 = vsub.f32 1.5, %v844_v61  ;;  %v1736_v61 = vld [vmem:[%s2611_s7 + $0x28] sm:$0xff] }
 0x802   :  { %v846_v63 = vmul.f32 %v1848_v57, %v845_v62  ;;  %v1735_v62 = vld [vmem:[%s2611_s7 + $0x20] sm:$0xff] }
 0x804   :  { %v850_v36 = vsel %vm849_vm8, %v1848_v57, %v846_v63 }
 0x805   :  { %v861_v1 = vmul.f32 %v850_v36, %v827_v35 }
 0x807   :  { %v866_v3 = vmul.f32 %v1806_v0, %v861_v1 }
 0x809   :  { %v2399_v4 = vadd.f32 %v1807_v2, %v866_v3 }
 0x80b   :  { %1733 = vmatmul.msk.f32.vlgmr.msra.gmra.mxu0 %vm175_vm1, %v2399_v4 }
 0x87a   :  { %v812_v5 = vpop.f32.mrf.mxu2 }
 0x87b   :  { %v813_v6 = vadd.f32 %v2369_v15, %v812_v5 }
 0x87d   :  { %v816_v7 = vadd.f32 %v813_v6, %v717_v32 }
 0x87f   :  { %v822_v8 = vsel %vm175_vm1, %v816_v7, 0.0 }
 0x880   :  { %823 = vadd.xlane.f32.xlu0 %v822_v8 }
 0x888   :  { %v906_v10 = vpop.f32.mrf.mxu0 }
 0x889   :  { %v2408_v11 = vadd.f32 %v1808_v9, %v906_v10 }
 0x88b   :  { %920 = vrot.lane.b32.xlu1 %v2408_v11, %s1932_s5 }
 0x893   :  { %1109 = vrot.lane.b32.xlu1 %v2408_v11, %s1933_s23 }
 0x89b   :  { %1023 = vrot.lane.b32.xlu1 %v2408_v11, %s1934_s4 }
 0x8f3   :  { %v824_v12 = vpop.xlane.xlu0 %823 }
 0x8f4   :  { %v826_v13 = vmul.f32 %v824_v12, %v2202_v58 }
 0x8f6   :  { %v828_v14 = vsub.f32 %v816_v7, %v826_v13 }
 0x8f8   :  { %v830_v15 = vmul.f32 %v828_v14, %v828_v14 }
 0x8fa   :  { %v834_v16 = vsel %vm175_vm1, %v830_v15, 0.0 }
 0x8fb   :  { %835 = vadd.xlane.f32.xlu2 %v834_v16 }
 0x8fd   :  { %v921_v17 = vpop.permute.xlu1 %920 }
 0x8fe   :  { %1740 = vmatpush.xpose.msk.msra.mxu3 %vm282_vm9, %v921_v17 }
 0x901   :  { %1741 = vmatmul.msk.f32.vlgmr.msra.gmra.mxu3 %vm282_vm9, %v2408_v11 }
 0x905   :  { %v1110_v18 = vpop.permute.xlu1 %1109 }
 0x90d   :  { %v1024_v19 = vpop.permute.xlu1 %1023 }
 0x90e   :  { %1044 = vmatpush.msrb.mxu0 %v1024_v19 }
 0x96e   :  { %v836_v20 = vpop.xlane.xlu2 %835 }
 0x96f   :  { %v838_v31 = vmul.f32 %v836_v20, %v2202_v58 }
 0x971   :  { %v840_v21 = vadd.f32 1e-12, %v838_v31 }
 0x973   :  { %1849 = vrsqrt.f32 %v840_v21  ;;  %vm857_vm12 = vweird.f32 %v840_v21 }
 0x979   :  { %v1850_v22 = vpop.eup %1849 }
 0x97a   :  { %v852_v23 = vmul.f32 %v1850_v22, %v840_v21  ;;  %vm858_vm11 = vweird.f32 %v1850_v22 }
 0x97b   :  { %vm859_vm13 = vmor %vm857_vm12, %vm858_vm11 }
 0x97c   :  { %v853_v24 = vmul.f32 %v1850_v22, %v852_v23 }
 0x97e   :  { %v854_v25 = vmul.f32 0.5, %v853_v24 }
 0x980   :  { %v855_v26 = vsub.f32 1.5, %v854_v25 }
 0x982   :  { %v856_v27 = vmul.f32 %v1850_v22, %v855_v26 }
 0x984   :  { %v943_v28 = vpop.f32.mrf.mxu3  ;;  %v860_v29 = vsel %vm859_vm13, %v1850_v22, %v856_v27 }
 0x985   :  { %v973_v30 = vmul.f32 0.25, %v943_v28  ;;  %v862_v32 = vmul.f32 %v860_v29, %v828_v14 }
 0x987   :  { %v975_v33 = vsel %vm336_vm10, %v973_v30, -inf  ;;  %v867_v34 = vmul.f32 %v1806_v0, %v862_v32 }
 0x988   :  { %976 = vmax.xlane.f32.xlu0 %v975_v33 }
 0x989   :  { %v2423_v35 = vadd.f32 %v1807_v2, %v867_v34 }
 0x98b   :  { %1734 = vmatmul.msk.f32.gmra.mxu0 %vm175_vm1, %v2423_v35 }
 0x9fb   :  { %v977_v37 = vpop.xlane.xlu0 %976 }
 0x9fc   :  { %v981_v38 = vsub.f32 %v973_v30, %v977_v37 }
 0x9fe   :  { %v983_v39 = vmul.f32 1.442695, %v981_v38 }
 0xa00   :  { %1851 = vpow2.f32 %v983_v39 }
 0xa06   :  { %v1852_v40 = vpop.eup %1851 }
 0xa07   :  { %v987_v41 = vsel %vm336_vm10, %v1852_v40, 0.0 }
 0xa08   :  { %988 = vadd.xlane.f32.xlu2 %v987_v41  ;;  %v909_v43 = vpop.f32.mrf.mxu0 }
 0xa09   :  { %v2428_v42 = vadd.f32 %v1808_v9, %v909_v43 }
 0xa0b   :  { %1137 = vrot.lane.b32.xlu1 %v2428_v42, %s1933_s23  ;;  %947 = vrot.lane.b32.xlu0 %v2428_v42, %s1932_s5  ;;  %s2654_s23 = sld [smem:[#allocation17_spill]] }
 0xa13   :  { %1139 = vrot.lane.b32.xlu0 %v2428_v42, %s1931_s24 }
 0xa20   :  { %1111 = vrot.lane.b32.xlu2 %v2408_v11, %s1931_s24 }
 0xa7b   :  { %v989_v44 = vpop.xlane.xlu2 %988 }
 0xa7c   :  { %1853 = vrcp.f32 %v989_v44  ;;  %v1004_v50 = vand.u32 2147483648, %v989_v44  ;;  %v1002_v53 = vand.u32 2147483647, %v989_v44  ;;  %vm998_vm15 = vweird.f32 %v989_v44 }
 0xa7d   :  { %v948_v45 = vpop.permute.xlu0 %947  ;;  %v1138_v60 = vpop.permute.xlu1 %1137 }
 0xa7e   :  { %1742 = vmatpush.xpose.msk.msrb.mxu1 %vm282_vm9, %v948_v45  ;;  %v1005_v55 = vor.u32 1.1754944e-38, %v1004_v50  ;;  %vm1003_vm3 = vcmp.eq.f32.partialorder %v1002_v53, 8.507059e+37 }
 0xa81   :  { %1743 = vmatmul.msk.f32.vlgmr.msrb.gmra.mxu1 %vm282_vm9, %v2428_v42 }
 0xa82   :  { %v1854_v46 = vpop.eup %1853  ;;  %1095 = vmatpush.msra.mxu1 %v1736_v61 }
 0xa83   :  { %v994_v47 = vmul.f32 %v1854_v46, %v989_v44  ;;  %v1112_v48 = vpop.permute.xlu2 %1111  ;;  %vm999_vm14 = vweird.f32 %v1854_v46 }
 0xa84   :  { %1748 = vmatpush.xpose.msk.msra.mxu2 %vm282_vm9, %v1112_v48  ;;  %vm1000_vm0 = vmor %vm998_vm15, %vm999_vm14  ;;  %1096 = vmatpush.msra.mxu1 %v1735_v62 }
 0xa85   :  { %v995_v49 = vsub.f32 1.0, %v994_v47  ;;  %v1140_v51 = vpop.permute.xlu0 %1139 }
 0xa86   :  { %1750 = vmatpush.xpose.msk.msra.mxu0 %vm282_vm9, %v1140_v51 }
 0xa87   :  { %v996_v52 = vmul.f32 %v1854_v46, %v995_v49  ;;  %1749 = vmatmul.msk.f32.vlgmr.msra.gmra.mxu2 %vm282_vm9, %v1110_v18 }
 0xa89   :  { %v997_v54 = vadd.f32 %v1854_v46, %v996_v52 }
 0xa8b   :  { %v1001_v56 = vsel %vm1000_vm0, %v1854_v46, %v997_v54 }
 0xa8c   :  { %v1006_v57 = vsel %vm1003_vm3, %v1005_v55, %v1001_v56 }
 0xa8d   :  { %v1007_v59 = vmul.f32 %v1852_v40, %v1006_v57 }
 0xa8f   :  { %1744 = vmatmul.msk.f32.vlgmr.msrb.gmra.mxu0 %vm336_vm10, %v1007_v59 }
 0xa97   :  { %1751 = vmatmul.msk.f32.vlgmr.msra.gmra.mxu0 %vm282_vm9, %v1138_v60 }
 0xafe   :  { %v970_v63 = vpop.f32.mrf.mxu1 }
 0xaff   :  { %v974_v0 = vmul.f32 0.25, %v970_v63 }
 0xb01   :  { %v978_v36 = vsel %vm336_vm10, %v974_v0, -inf }
 0xb02   :  { %979 = vmax.xlane.f32.xlu0 %v978_v36 }
 0xb0a   :  { %v1134_v1 = vpop.f32.mrf.mxu2 }
 0xb0b   :  { %v1165_v2 = vmul.f32 0.25, %v1134_v1  ;;  %v1738_v1 = vld [vmem:[%s2611_s7 + $0x38] sm:$0xff] }
 0xb0c   :  { %v1046_v3 = vpop.f32.mrf.mxu0  ;;  %1287 = vmatpush.msrb.mxu0 %v1738_v1  ;;  %v1769_v1 = vld [vmem:[%s2617_s13 + $0x60] sm:$0xff] }
 0xb0d   :  { %1746 = vmatmul.msk.f32.vlgmr.msra.gmra.mxu1 %vm282_vm9, %v1046_v3  ;;  %v1167_v5 = vsel %vm336_vm10, %v1165_v2, -inf }
 0xb0e   :  { %1168 = vmax.xlane.f32.xlu2 %v1167_v5 }
 0xb14   :  { %v1162_v6 = vpop.f32.mrf.mxu0 }
 0xb15   :  { %v1166_v7 = vmul.f32 0.25, %v1162_v6 }
 0xb17   :  { %v1170_v8 = vsel %vm336_vm10, %v1166_v7, -inf }
 0xb18   :  { %1171 = vmax.xlane.f32.xlu1 %v1170_v8 }
 0xb75   :  { %v980_v9 = vpop.xlane.xlu0 %979 }
 0xb76   :  { %v982_v10 = vsub.f32 %v974_v0, %v980_v9 }
 0xb78   :  { %v985_v12 = vmul.f32 1.442695, %v982_v10 }
 0xb7a   :  { %1855 = vpow2.f32 %v985_v12 }
 0xb80   :  { %v1856_v13 = vpop.eup %1855 }
 0xb81   :  { %v1169_v14 = vpop.xlane.xlu2 %1168  ;;  %v990_v16 = vsel %vm336_vm10, %v1856_v13, 0.0 }
 0xb82   :  { %v1173_v15 = vsub.f32 %v1165_v2, %v1169_v14  ;;  %991 = vadd.xlane.f32.xlu0 %v990_v16  ;;  %v1737_v2 = vld [vmem:[%s2611_s7 + $0x30] sm:$0xff] }
 0xb83   :  { %1288 = vmatpush.msrb.mxu0 %v1737_v2  ;;  %v1768_v2 = vld [vmem:[%s2617_s13 + $0x58] sm:$0xff] }
 0xb84   :  { %v1175_v17 = vmul.f32 1.442695, %v1173_v15 }
 0xb86   :  { %1857 = vpow2.f32 %v1175_v17 }
 0xb8a   :  { %v1098_v8 = vpop.f32.mrf.mxu1 }
 0xb8b   :  { %v1172_v18 = vpop.xlane.xlu1 %1171 }
 0xb8c   :  { %v1858_v19 = vpop.eup %1857  ;;  %v1174_v20 = vsub.f32 %v1166_v7, %v1172_v18  ;;  %v1809_v7 = vld [vmem:[%s2612_s8 + $0x1] ss:$0 sm:$0xff] }
 0xb8d   :  { %v1179_v31 = vsel %vm336_vm10, %v1858_v19, 0.0  ;;  %v1107_v9 = vadd.f32 %v1809_v7, %v1098_v8 }
 0xb8e   :  { %v1177_v21 = vmul.f32 1.442695, %v1174_v20  ;;  %1180 = vadd.xlane.f32.xlu2 %v1179_v31 }
 0xb90   :  { %1859 = vpow2.f32 %v1177_v21 }
 0xb96   :  { %v2458_v22 = vpop.eup %1859  ;;  %1049 = vrot.lane.b32.xlu0 %v2428_v42, %s1934_s4 }
 0xb97   :  { %v1182_v23 = vsel %vm336_vm10, %v2458_v22, 0.0 }
 0xb98   :  { %1183 = vadd.xlane.f32.xlu1 %v1182_v23 }
 0xba6   :  { %1215 = vrot.lane.b32.xlu2 %v2408_v11, %s1935_s25 }
 0xbb1   :  { %1241 = vrot.lane.b32.xlu1 %v2428_v42, %s1935_s25 }
 0xbf5   :  { %v992_v24 = vpop.xlane.xlu0 %991 }
 0xbf6   :  { %1861 = vrcp.f32 %v992_v24  ;;  %v1019_v28 = vand.u32 2147483648, %v992_v24  ;;  %v1017_v32 = vand.u32 2147483647, %v992_v24  ;;  %vm1013_vm5 = vweird.f32 %v992_v24 }
 0xbf8   :  { %v1020_v34 = vor.u32 1.1754944e-38, %v1019_v28  ;;  %vm1018_vm7 = vcmp.eq.f32.partialorder %v1017_v32, 8.507059e+37  ;;  %v1758_v32 = vld [vmem:[%s2615_s11 + $0x20] sm:$0xff] }
 0xbfc   :  { %v1862_v25 = vpop.eup %1861 }
 0xbfd   :  { %v1009_v26 = vmul.f32 %v1862_v25, %v992_v24  ;;  %vm1014_vm4 = vweird.f32 %v1862_v25 }
 0xbfe   :  { %vm1015_vm6 = vmor %vm1013_vm5, %vm1014_vm4 }
 0xbff   :  { %v1010_v27 = vsub.f32 1.0, %v1009_v26 }
 0xc01   :  { %v1181_v29 = vpop.xlane.xlu2 %1180  ;;  %v1011_v30 = vmul.f32 %v1862_v25, %v1010_v27 }
 0xc02   :  { %1863 = vrcp.f32 %v1181_v29  ;;  %v1196_v45 = vand.u32 2147483648, %v1181_v29  ;;  %v1194_v47 = vand.u32 2147483647, %v1181_v29  ;;  %vm1190_vm11 = vweird.f32 %v1181_v29 }
 0xc03   :  { %v1012_v33 = vadd.f32 %v1862_v25, %v1011_v30  ;;  %v1759_v30 = vld [vmem:[%s2615_s11 + $0x28] sm:$0xff] }
 0xc04   :  { %v1197_v49 = vor.u32 1.1754944e-38, %v1196_v45  ;;  %vm1195_vm13 = vcmp.eq.f32.partialorder %v1194_v47, 8.507059e+37 }
 0xc05   :  { %v1016_v37 = vsel %vm1015_vm6, %v1862_v25, %v1012_v33 }
 0xc06   :  { %v1021_v11 = vsel %vm1018_vm7, %v1020_v34, %v1016_v37 }
 0xc07   :  { %v1022_v39 = vmul.f32 %v1856_v13, %v1021_v11 }
 0xc08   :  { %v1864_v38 = vpop.eup %1863  ;;  %v1050_v41 = vpop.permute.xlu0 %1049 }
 0xc09   :  { %v1186_v40 = vmul.f32 %v1864_v38, %v1181_v29  ;;  %v1216_v43 = vpop.permute.xlu2 %1215  ;;  %1070 = vmatpush.msrb.mxu3 %v1050_v41  ;;  %vm1191_vm8 = vweird.f32 %v1864_v38  ;;  %v1760_v29 = vld [vmem:[%s2615_s11 + $0x30] sm:$0xff] }
 0xc0a   :  { %1745 = vmatmul.msk.f32.vlgmr.msrb.gmra.mxu3 %vm336_vm10, %v1022_v39  ;;  %vm1192_vm12 = vmor %vm1190_vm11, %vm1191_vm8 }
 0xc0b   :  { %v1187_v42 = vsub.f32 1.0, %v1186_v40  ;;  %v1184_v44 = vpop.xlane.xlu1 %1183  ;;  %1236 = vmatpush.msra.mxu3 %v1216_v43 }
 0xc0c   :  { %1865 = vrcp.f32 %v1184_v44  ;;  %v1211_v59 = vand.u32 2147483648, %v1184_v44  ;;  %vm1205_vm15 = vweird.f32 %v1184_v44  ;;  %v1209_v60 = vand.u32 2147483647, %v1184_v44 }
 0xc0d   :  { %v1188_v46 = vmul.f32 %v1864_v38, %v1187_v42 }
 0xc0e   :  { %v1212_v62 = vor.u32 1.1754944e-38, %v1211_v59  ;;  %vm1210_vm3 = vcmp.eq.f32.partialorder %v1209_v60, 8.507059e+37 }
 0xc0f   :  { %v1189_v48 = vadd.f32 %v1864_v38, %v1188_v46  ;;  %v1810_v46 = vld [vmem:[%s2613_s9 + $0x1] ss:$0 sm:$0xff] }
 0xc11   :  { %v1193_v50 = vsel %vm1192_vm12, %v1864_v38, %v1189_v48 }
 0xc12   :  { %v1866_v51 = vpop.eup %1865  ;;  %v1198_v52 = vsel %vm1195_vm13, %v1197_v49, %v1193_v50  ;;  %v1811_v49 = vld [vmem:[%s2614_s10 + $0x1] ss:$0 sm:$0xff] }
 0xc13   :  { %v1201_v53 = vmul.f32 %v1866_v51, %v1184_v44  ;;  %v1199_v54 = vmul.f32 %v1858_v19, %v1198_v52  ;;  %vm1206_vm14 = vweird.f32 %v1866_v51 }
 0xc14   :  { %vm1207_vm0 = vmor %vm1205_vm15, %vm1206_vm14 }
 0xc15   :  { %v1202_v55 = vsub.f32 1.0, %v1201_v53  ;;  %1752 = vmatmul.msk.f32.vlgmr.msra.gmra.mxu3 %vm336_vm10, %v1199_v54 }
 0xc17   :  { %v1203_v56 = vmul.f32 %v1866_v51, %v1202_v55 }
 0xc19   :  { %v1204_v57 = vadd.f32 %v1866_v51, %v1203_v56 }
 0xc1b   :  { %v1208_v61 = vsel %vm1207_vm0, %v1866_v51, %v1204_v57 }
 0xc1c   :  { %v1213_v63 = vsel %vm1210_vm3, %v1212_v62, %v1208_v61 }
 0xc1d   :  { %v1214_v36 = vmul.f32 %v2458_v22, %v1213_v63  ;;  %v1772_v63 = vld [vmem:[%s2617_s13 + $0x78] sm:$0xff] }
 0xc1e   :  { %1443 = vmatpush.msrb.mxu1 %v1772_v63 }
 0xc23   :  { %v1242_v0 = vpop.permute.xlu1 %1241 }
 0xc24   :  { %1262 = vmatpush.msrb.mxu2 %v1242_v0  ;;  %v1771_v0 = vld [vmem:[%s2617_s13 + $0x70] sm:$0xff] }
 0xc25   :  { %1753 = vmatmul.msk.f32.vlgmr.msrb.gmra.mxu2 %vm336_vm10, %v1214_v36  ;;  %1444 = vmatpush.msrb.mxu1 %v1771_v0  ;;  %v1770_v36 = vld [vmem:[%s2617_s13 + $0x68] sm:$0xff] }
 0xc27   :  { %1445 = vmatpush.msrb.mxu1 %v1770_v36 }
 0xc29   :  { %1446 = vmatpush.msrb.mxu1 %v1769_v1 }
 0xc2b   :  { %1447 = vmatpush.msrb.mxu1 %v1768_v2 }
 0xc8d   :  { %v1072_v3 = vpop.f32.mrf.mxu3 }
 0xc8e   :  { %1747 = vmatmul.msk.f32.gmra.mxu1 %vm282_vm9, %v1072_v3  ;;  %v1767_v3 = vld [vmem:[%s2617_s13 + $0x50] sm:$0xff] }
 0xc8f   :  { %1448 = vmatpush.msrb.mxu1 %v1767_v3  ;;  %v1814_v3 = vld [vmem:[%s2651_s15 + $0x1] ss:$0 sm:$0xff] }
 0xc98   :  { %v1238_v5 = vpop.f32.mrf.mxu3 }
 0xc99   :  { %1754 = vmatmul.msk.f32.vlgmr.msrb.gmra.mxu0 %vm282_vm9, %v1238_v5  ;;  %v1766_v5 = vld [vmem:[%s2617_s13 + $0x48] sm:$0xff] }
 0xc9a   :  { %1449 = vmatpush.msrb.mxu1 %v1766_v5 }
 0xca8   :  { %v1264_v6 = vpop.f32.mrf.mxu2 }
 0xca9   :  { %1755 = vmatmul.msk.f32.gmra.mxu0 %vm282_vm9, %v1264_v6  ;;  %v1765_v6 = vld [vmem:[%s2617_s13 + $0x40] sm:$0xff] }
 0xcaa   :  { %1450 = vmatpush.msrb.mxu1 %v1765_v6 }
 0xd0b   :  { %v1101_v15 = vpop.f32.mrf.mxu1 }
 0xd0c   :  { %v1108_v16 = vadd.f32 %v1809_v7, %v1101_v15  ;;  %v1812_v7 = vld [vmem:[%s2616_s12 + $0x1] ss:$0 sm:$0xff] }
 0xd16   :  { %v1290_v10 = vpop.f32.mrf.mxu0 }
 0xd17   :  { %v1296_v12 = vadd.f32 %v1290_v10, %v1107_v9 }
 0xd19   :  { %v1298_v13 = vadd.f32 %v1296_v12, %v2399_v4 }
 0xd1b   :  { %v1304_v14 = vsel %vm175_vm1, %v1298_v13, 0.0 }
 0xd1c   :  { %1305 = vadd.xlane.f32.xlu0 %v1304_v14 }
 0xd26   :  { %v1293_v17 = vpop.f32.mrf.mxu0 }
 0xd27   :  { %v1297_v18 = vadd.f32 %v1293_v17, %v1108_v16 }
 0xd29   :  { %v1299_v19 = vadd.f32 %v1297_v18, %v2423_v35  ;;  %v1761_v35 = vld [vmem:[%s2615_s11 + $0x38] sm:$0xff] }
 0xd2a   :  { %1386 = vmatpush.msrb.mxu3 %v1761_v35  ;;  %v1813_v35 = vld [vmem:[%s2618_s14 + $0x1] ss:$0 sm:$0xff]  ;;  %s2656_s14 = sld [smem:[#allocation20_spill]] }
 0xd2b   :  { %v1307_v20 = vsel %vm175_vm1, %v1299_v19, 0.0 }
 0xd2c   :  { %1308 = vadd.xlane.f32.xlu2 %v1307_v20  ;;  %1387 = vmatpush.msrb.mxu3 %v1760_v29 }
 0xd2e   :  { %1388 = vmatpush.msrb.mxu3 %v1759_v30 }
 0xd30   :  { %1389 = vmatpush.msrb.mxu3 %v1758_v32  ;;  %s1664_s29 = sshll.u32 %s2656_s14, 4  ;;  %s1665_s29 = int_to_ptr.hbm [resolvable:$true] %s1664_s29 }
 0xd8f   :  { %v1306_v31 = vpop.xlane.xlu0 %1305 }
 0xd90   :  { %v1310_v21 = vmul.f32 %v1306_v31, %v2202_v58 }
 0xd92   :  { %v1312_v22 = vsub.f32 %v1298_v13, %v1310_v21 }
 0xd94   :  { %v1314_v23 = vmul.f32 %v1312_v22, %v1312_v22 }
 0xd96   :  { %v1316_v24 = vsel %vm175_vm1, %v1314_v23, 0.0 }
 0xd97   :  { %1317 = vadd.xlane.f32.xlu1 %v1316_v24 }
 0xd9f   :  { %v1309_v4 = vpop.xlane.xlu2 %1308 }
 0xda0   :  { %v1311_v25 = vmul.f32 %v1309_v4, %v2202_v58 }
 0xda2   :  { %v1313_v26 = vsub.f32 %v1299_v19, %v1311_v25 }
 0xda4   :  { %v1315_v27 = vmul.f32 %v1313_v26, %v1313_v26 }
 0xda6   :  { %v1319_v28 = vsel %vm175_vm1, %v1315_v27, 0.0 }
 0xda7   :  { %1320 = vadd.xlane.f32.xlu0 %v1319_v28 }
 0xe0a   :  { %v1318_v33 = vpop.xlane.xlu1 %1317 }
 0xe0b   :  { %v1322_v34 = vmul.f32 %v1318_v33, %v2202_v58 }
 0xe0d   :  { %v1324_v37 = vadd.f32 1e-12, %v1322_v34 }
 0xe0f   :  { %1867 = vrsqrt.f32 %v1324_v37  ;;  %vm1332_vm10 = vweird.f32 %v1324_v37 }
 0xe15   :  { %v1868_v11 = vpop.eup %1867 }
 0xe16   :  { %v1327_v38 = vmul.f32 %v1868_v11, %v1324_v37  ;;  %vm1333_vm9 = vweird.f32 %v1868_v11 }
 0xe17   :  { %vm1334_vm4 = vmor %vm1332_vm10, %vm1333_vm9  ;;  %vm1610_vm10 = vcmask 7168  }
 0xe18   :  { %v1328_v39 = vmul.f32 %v1868_v11, %v1327_v38 }
 0xe1a   :  { %v1329_v40 = vmul.f32 0.5, %v1328_v39  ;;  %v1321_v41 = vpop.xlane.xlu0 %1320 }
 0xe1b   :  { %v1323_v43 = vmul.f32 %v1321_v41, %v2202_v58 }
 0xe1c   :  { %v1330_v42 = vsub.f32 1.5, %v1329_v40 }
 0xe1d   :  { %v1325_v44 = vadd.f32 1e-12, %v1323_v43 }
 0xe1e   :  { %v1331_v45 = vmul.f32 %v1868_v11, %v1330_v42 }
 0xe1f   :  { %1869 = vrsqrt.f32 %v1325_v44  ;;  %vm1342_vm6 = vweird.f32 %v1325_v44 }
 0xe20   :  { %v1335_v47 = vsel %vm1334_vm4, %v1868_v11, %v1331_v45 }
 0xe21   :  { %v1346_v48 = vmul.f32 %v1335_v47, %v1312_v22 }
 0xe23   :  { %v1351_v50 = vmul.f32 %v1810_v46, %v1346_v48 }
 0xe25   :  { %v1870_v51 = vpop.eup %1869  ;;  %v1356_v52 = vadd.f32 %v1811_v49, %v1351_v50  ;;  %v1520_v50 = vld [vmem:[%s2652_s1 + $0x10] sm:$0xff] }
 0xe26   :  { %v1337_v53 = vmul.f32 %v1870_v51, %v1325_v44  ;;  %vm1343_vm5 = vweird.f32 %v1870_v51 }
 0xe27   :  { %1763 = vmatmul.msk.f32.vlgmr.msrb.gmra.mxu3 %vm175_vm1, %v1356_v52  ;;  %vm1344_vm7 = vmor %vm1342_vm6, %vm1343_vm5 }
 0xe28   :  { %v1338_v54 = vmul.f32 %v1870_v51, %v1337_v53 }
 0xe2a   :  { %v1339_v55 = vmul.f32 0.5, %v1338_v54 }
 0xe2c   :  { %v1340_v56 = vsub.f32 1.5, %v1339_v55 }
 0xe2e   :  { %v1341_v57 = vmul.f32 %v1870_v51, %v1340_v56 }
 0xe30   :  { %v1345_v59 = vsel %vm1344_vm7, %v1870_v51, %v1341_v57  ;;  %v1519_v51 = vld [vmem:[%s2652_s1 + $0x8] sm:$0xff] }
 0xe31   :  { %v1347_v60 = vmul.f32 %v1345_v59, %v1313_v26  ;;  %v2568_v59 = vld [vmem:[%s2653_s27] sm:$0xff] }
 0xe32   :  { %vm1559_vm3 = vcmp.ne.s32.totalorder %v2568_v59, 4294967196 }
 0xe33   :  { %v1352_v61 = vmul.f32 %v1810_v46, %v1347_v60 }
 0xe35   :  { %v1357_v62 = vadd.f32 %v1811_v49, %v1352_v61  ;;  %v1521_v49 = vld [vmem:[%s2652_s1 + $0x18] sm:$0xff]  ;;  %v1936_v61 = vmov 0  }
 0xe36   :  { %1544 = vmatpush.msra.mxu2 %v1521_v49  ;;  %1796 = vset.pattern.permute.xlu2 %v1936_v61 }
 0xe37   :  { %1764 = vmatmul.msk.f32.gmra.mxu3 %vm175_vm1, %v1357_v62  ;;  %1797 = vset.pattern.permute.xlu0 %v1936_v61 }
 0xe38   :  { %1545 = vmatpush.msra.mxu2 %v1520_v50 }
 0xe3a   :  { %1546 = vmatpush.msra.mxu2 %v1519_v51 }
 0xeaa   :  { %v1391_v8 = vpop.f32.mrf.mxu3 }
 0xeab   :  { %v1392_v9 = vadd.f32 %v1812_v7, %v1391_v8 }
 0xead   :  { %v1397_v10 = vmul.f32 %v1392_v9, %v1392_v9 }
 0xeaf   :  { %v1399_v12 = vmul.f32 %v1397_v10, %v1392_v9 }
 0xeb1   :  { %v1401_v13 = vmul.f32 0.044715, %v1399_v12 }
 0xeb3   :  { %v1403_v14 = vadd.f32 %v1401_v13, %v1392_v9 }
 0xeb5   :  { %v1405_v15 = vmul.f32 0.7978846, %v1403_v14 }
 0xeb7   :  { %1871 = vtanh.f32 %v1405_v15 }
 0xeba   :  { %v1394_v16 = vpop.f32.mrf.mxu3 }
 0xebb   :  { %v1395_v17 = vadd.f32 %v1812_v7, %v1394_v16  ;;  %v1815_v7 = vld [vmem:[%s2620_s16 + $0x1] ss:$0 sm:$0xff] }
 0xebd   :  { %v1872_v18 = vpop.eup %1871  ;;  %v1398_v19 = vmul.f32 %v1395_v17, %v1395_v17 }
 0xebe   :  { %v1409_v20 = vadd.f32 1.0, %v1872_v18 }
 0xebf   :  { %v1400_v31 = vmul.f32 %v1398_v19, %v1395_v17 }
 0xec0   :  { %v1411_v21 = vmul.f32 0.5, %v1409_v20  ;;  %v1565_v20 = vlaneseq }
 0xec1   :  { %v1402_v22 = vmul.f32 0.044715, %v1400_v31 }
 0xec2   :  { %v1413_v23 = vmul.f32 %v1411_v21, %v1392_v9  ;;  %v1566_v31 = vand.u32 127, %v1565_v20  ;;  %v1816_v21 = vld [vmem:[%s2654_s23] ss:$0 sm:$0xff] }
 0xec3   :  { %v1404_v24 = vadd.f32 %v1402_v22, %v1395_v17 }
 0xec4   :  { %1774 = vmatmul.msk.f32.vlgmr.msrb.gmra.mxu1 %vm785_vm2, %v1413_v23  ;;  %vm1567_vm15 = vcmp.lt.s32.totalorder %v1566_v31, 5 }
 0xec5   :  { %v1406_v4 = vmul.f32 0.7978846, %v1404_v24 }
 0xec7   :  { %1873 = vtanh.f32 %v1406_v4 }
 0xecd   :  { %v1874_v25 = vpop.eup %1873 }
 0xece   :  { %v1410_v26 = vadd.f32 1.0, %v1874_v25 }
 0xed0   :  { %v1412_v27 = vmul.f32 0.5, %v1410_v26 }
 0xed2   :  { %v1414_v28 = vmul.f32 %v1412_v27, %v1395_v17  ;;  %v1558_v27 = vld [vmem:[%s2653_s27 + $0x8] sm:$0xff] }
 0xed3   :  { %vm1560_vm9 = vcmp.ne.s32.totalorder %v1558_v27, 4294967196 }
 0xed4   :  { %1775 = vmatmul.msk.f32.gmra.mxu1 %vm785_vm2, %v1414_v28 }
 0xf41   :  { %v1452_v29 = vpop.f32.mrf.mxu1 }
 0xf42   :  { %v1453_v30 = vadd.f32 %v1813_v35, %v1452_v29 }
 0xf44   :  { %v1458_v32 = vadd.f32 %v1453_v30, %v1356_v52  ;;  %v1518_v52 = vld [vmem:[%s2652_s1] sm:$0xff] }
 0xf45   :  { %1547 = vmatpush.msra.mxu2 %v1518_v52 }
 0xf46   :  { %v1464_v33 = vsel %vm175_vm1, %v1458_v32, 0.0 }
 0xf47   :  { %1465 = vadd.xlane.f32.xlu2 %v1464_v33 }
 0xf51   :  { %v1455_v34 = vpop.f32.mrf.mxu1 }
 0xf52   :  { %v1456_v37 = vadd.f32 %v1813_v35, %v1455_v34 }
 0xf54   :  { %v1459_v11 = vadd.f32 %v1456_v37, %v1357_v62 }
 0xf56   :  { %v1467_v38 = vsel %vm175_vm1, %v1459_v11, 0.0 }
 0xf57   :  { %1468 = vadd.xlane.f32.xlu0 %v1467_v38 }
 0xfba   :  { %v1466_v39 = vpop.xlane.xlu2 %1465 }
 0xfbb   :  { %v1470_v40 = vmul.f32 %v1466_v39, %v2202_v58 }
 0xfbd   :  { %v1472_v41 = vsub.f32 %v1458_v32, %v1470_v40 }
 0xfbf   :  { %v1474_v43 = vmul.f32 %v1472_v41, %v1472_v41 }
 0xfc1   :  { %v1476_v42 = vsel %vm175_vm1, %v1474_v43, 0.0 }
 0xfc2   :  { %1477 = vadd.xlane.f32.xlu1 %v1476_v42  ;;  %v1937_v42 = vmov 0.0  }
 0xfca   :  { %v1469_v44 = vpop.xlane.xlu0 %1468 }
 0xfcb   :  { %v1471_v45 = vmul.f32 %v1469_v44, %v2202_v58  ;;  %v1780_v44 = vsel %vm1559_vm3, 1.0, %v1937_v42 }
 0xfcd   :  { %v1473_v46 = vsub.f32 %v1459_v11, %v1471_v45  ;;  %v1781_v45 = vsel %vm1560_vm9, 1.0, %v1937_v42 }
 0xfcf   :  { %v1475_v47 = vmul.f32 %v1473_v46, %v1473_v46 }
 0xfd1   :  { %v1479_v48 = vsel %vm175_vm1, %v1475_v47, 0.0  ;;  %v1612_v47 = vsel %vm1610_vm10, %v1781_v45, 0.0 }
 0xfd2   :  { %1480 = vadd.xlane.f32.xlu2 %v1479_v48 }
 0xfea   :  { %1593 = vperm.xlu2 %1796, %v2568_v59  }
0x1035   :  { %v1478_v53 = vpop.xlane.xlu1 %1477 }
0x1036   :  { %v1482_v54 = vmul.f32 %v1478_v53, %v2202_v58 }
0x1038   :  { %v1484_v55 = vadd.f32 1e-12, %v1482_v54 }
0x103a   :  { %1875 = vrsqrt.f32 %v1484_v55  ;;  %vm1492_vm8 = vweird.f32 %v1484_v55 }
0x1040   :  { %v1876_v56 = vpop.eup %1875 }
0x1041   :  { %v1487_v57 = vmul.f32 %v1876_v56, %v1484_v55  ;;  %vm1493_vm2 = vweird.f32 %v1876_v56 }
0x1042   :  { %vm1494_vm11 = vmor %vm1492_vm8, %vm1493_vm2  ;;  %vm1653_vm2 = vcmask 0  }
0x1043   :  { %v1488_v60 = vmul.f32 %v1876_v56, %v1487_v57 }
0x1045   :  { %v1489_v62 = vmul.f32 0.5, %v1488_v60  ;;  %v1481_v63 = vpop.xlane.xlu2 %1480 }
0x1046   :  { %v1483_v0 = vmul.f32 %v1481_v63, %v2202_v58 }
0x1047   :  { %v1490_v36 = vsub.f32 1.5, %v1489_v62 }
0x1048   :  { %v1485_v1 = vadd.f32 1e-12, %v1483_v0 }
0x1049   :  { %v1491_v2 = vmul.f32 %v1876_v56, %v1490_v36 }
0x104a   :  { %1877 = vrsqrt.f32 %v1485_v1  ;;  %vm1502_vm13 = vweird.f32 %v1485_v1 }
0x104b   :  { %v1495_v5 = vsel %vm1494_vm11, %v1876_v56, %v1491_v2 }
0x104c   :  { %v1506_v6 = vmul.f32 %v1495_v5, %v1472_v41 }
0x104d   :  { %v1594_v41 = vpop.permute.xlu2 %1593 }
0x104e   :  { %v1511_v8 = vmul.f32 %v1814_v3, %v1506_v6  ;;  %vm1598_vm0 = vcmp.eq.s32.totalorder %v1566_v31, %v1594_v41 }
0x1050   :  { %v1878_v9 = vpop.eup %1877  ;;  %v1516_v58 = vadd.f32 %v1815_v7, %v1511_v8 }
0x1051   :  { %v1497_v10 = vmul.f32 %v1878_v9, %v1485_v1  ;;  %vm1503_vm12 = vweird.f32 %v1878_v9 }
0x1052   :  { %1778 = vmatmul.msk.f32.vlgmr.msra.gmra.mxu2 %vm175_vm1, %v1516_v58  ;;  %vm1504_vm14 = vmor %vm1502_vm13, %vm1503_vm12 }
0x1053   :  { %v1498_v12 = vmul.f32 %v1878_v9, %v1497_v10 }
0x1055   :  { %v1499_v13 = vmul.f32 0.5, %v1498_v12 }
0x1057   :  { %v1500_v14 = vsub.f32 1.5, %v1499_v13 }
0x1059   :  { %v1501_v15 = vmul.f32 %v1878_v9, %v1500_v14 }
0x105b   :  { %v1505_v16 = vsel %vm1504_vm14, %v1878_v9, %v1501_v15 }
0x105c   :  { %v1507_v17 = vmul.f32 %v1505_v16, %v1473_v46  ;;  %v1611_v46 = vsel %vm1610_vm10, %v1780_v44, 0.0 }
0x105d   :  { %v1613_v48 = vadd.f32 %v1612_v47, %v1611_v46 }
0x105e   :  { %v1512_v18 = vmul.f32 %v1814_v3, %v1507_v17 }
0x1060   :  { %v1517_v19 = vadd.f32 %v1815_v7, %v1512_v18 }
0x1062   :  { %1779 = vmatmul.msk.f32.gmra.mxu2 %vm175_vm1, %v1517_v19 }
0x10d5   :  { %v1549_v22 = vpop.f32.mrf.mxu2 }
0x10d6   :  { %v1550_v23 = vadd.f32 %v1816_v21, %v1549_v22 }
0x10d8   :  { %1555 = vst [vmem:[%s2655_s17] sm:$0xff] %v1550_v23  ;;  %v1568_v24 = vsel %vm1567_vm15, %v1550_v23, -1e+30  ;;  %v1600_v43 = vsel %vm1598_vm0, %v1550_v23, 0.0 }
0x10d9   :  { %1570 = vmax.xlane.f32.xlu0 %v1568_v24 }
0x10e5   :  { %v1552_v4 = vpop.f32.mrf.mxu2 }
0x10e6   :  { %v1553_v25 = vadd.f32 %v1816_v21, %v1552_v4 }
0x10e8   :  { %1556 = vst [vmem:[%s2655_s17 + $0x8] sm:$0xff] %v1553_v25  ;;  %v1569_v26 = vsel %vm1567_vm15, %v1553_v25, -1e+30 }
0x10e9   :  { %1572 = vmax.xlane.f32.xlu1 %v1569_v26 }
0x10ed   :  { %1596 = vperm.xlu0 %1797, %v1558_v27  }
0x114c   :  { %v1571_v28 = vpop.xlane.xlu0 %1570 }
0x114d   :  { %v1574_v35 = vsub.f32 %v1568_v24, %v1571_v28 }
0x114f   :  { %v1576_v29 = vmul.f32 1.442695, %v1574_v35 }
0x1151   :  { %1879 = vpow2.f32 %v1576_v29 }
0x1157   :  { %v1880_v30 = vpop.eup %1879 }
0x1158   :  { %v1580_v32 = vsel %vm1567_vm15, %v1880_v30, 0.0 }
0x1159   :  { %1582 = vadd.xlane.f32.xlu1 %v1580_v32 }
0x115c   :  { %v1573_v33 = vpop.xlane.xlu1 %1572 }
0x115d   :  { %v1575_v34 = vsub.f32 %v1569_v26, %v1573_v33 }
0x115f   :  { %v1578_v37 = vmul.f32 1.442695, %v1575_v34  ;;  %v1597_v11 = vpop.permute.xlu0 %1596 }
0x1160   :  { %vm1599_vm1 = vcmp.eq.s32.totalorder %v1566_v31, %v1597_v11 }
0x1161   :  { %1881 = vpow2.f32 %v1578_v37  ;;  %v1601_v38 = vsel %vm1599_vm1, %v1553_v25, 0.0 }
0x1162   :  { %1604 = vadd.xlane.f32.xlu2 %v1601_v38 }
0x1167   :  { %v1882_v39 = vpop.eup %1881 }
0x1168   :  { %v1581_v40 = vsel %vm1567_vm15, %v1882_v39, 0.0 }
0x1169   :  { %1584 = vadd.xlane.f32.xlu1 %v1581_v40 }
0x1171   :  { %1602 = vadd.xlane.f32.xlu1 %v1600_v43 }
0x1179   :  { %1614 = vadd.xlane.f32.xlu1 %v1613_v48 }
0x11cc   :  { %v1583_v49 = vpop.xlane.xlu1 %1582 }
0x11cd   :  { %1883 = vlog2.f32 %v1583_v49 }
0x11d3   :  { %v1884_v50 = vpop.eup %1883 }
0x11d4   :  { %v1587_v52 = vmul.f32 0.6931472, %v1884_v50 }
0x11d5   :  { %v1605_v60 = vpop.xlane.xlu2 %1604 }
0x11d6   :  { %v1590_v54 = vadd.f32 %v1587_v52, %v1571_v28 }
0x11dc   :  { %v1585_v51 = vpop.xlane.xlu1 %1584 }
0x11dd   :  { %1885 = vlog2.f32 %v1585_v51 }
0x11e3   :  { %v1886_v53 = vpop.eup %1885 }
0x11e4   :  { %v1589_v55 = vmul.f32 0.6931472, %v1886_v53  ;;  %v1603_v56 = vpop.xlane.xlu1 %1602 }
0x11e5   :  { %v1606_v57 = vsub.f32 %v1590_v54, %v1603_v56 }
0x11e6   :  { %v1591_v59 = vadd.f32 %v1589_v55, %v1573_v33 }
0x11e7   :  { %v1608_v62 = vmul.f32 %v1780_v44, %v1606_v57 }
0x11e8   :  { %v1607_v61 = vsub.f32 %v1591_v59, %v1605_v60 }
0x11e9   :  { %v1625_v0 = vsel %vm1610_vm10, %v1608_v62, 0.0 }
0x11ea   :  { %v1609_v63 = vmul.f32 %v1781_v45, %v1607_v61 }
0x11ec   :  { %v1626_v36 = vsel %vm1610_vm10, %v1609_v63, 0.0  ;;  %v1615_v2 = vpop.xlane.xlu1 %1614 }
0x11ed   :  { %v1627_v1 = vadd.f32 %v1626_v36, %v1625_v0  ;;  %v1616_v3 = vrot.slane %v1615_v2, 4 }
0x11ef   :  { %1628 = vadd.xlane.f32.xlu1 %v1627_v1  ;;  %v1617_v5 = vadd.f32 %v1616_v3, %v1615_v2 }
0x11f1   :  { %v1618_v6 = vrot.slane %v1617_v5, 2 }
0x11f3   :  { %v1619_v7 = vadd.f32 %v1618_v6, %v1617_v5 }
0x11f5   :  { %v1620_v8 = vrot.slane %v1619_v7, 1 }
0x11f7   :  { %v1621_v9 = vadd.f32 %v1620_v8, %v1619_v7 }
0x11f9   :  { %1782 = vpush %v1621_v9 }
0x122a   :  { %s1783_s8 = spop %1782 }
0x122b   :  { %v1623_v17 = vstv %s1783_s8 }
0x122c   :  { %v1624_v18 = vmax.f32 %v1623_v17, 1.0 }
0x122e   :  { %1887 = vrcp.f32 %v1624_v18  ;;  %vm1643_vm4 = vweird.f32 %v1624_v18  ;;  %v1649_v22 = vand.u32 2147483648, %v1624_v18  ;;  %v1647_v24 = vand.u32 2147483647, %v1624_v18 }
0x1230   :  { %v1650_v4 = vor.u32 1.1754944e-38, %v1649_v22  ;;  %vm1648_vm7 = vcmp.eq.f32.partialorder %v1647_v24, 8.507059e+37 }
0x1234   :  { %v1888_v19 = vpop.eup %1887 }
0x1235   :  { %v1639_v20 = vmul.f32 %v1888_v19, %v1624_v18  ;;  %vm1644_vm5 = vweird.f32 %v1888_v19 }
0x1236   :  { %vm1645_vm6 = vmor %vm1643_vm4, %vm1644_vm5 }
0x1237   :  { %v1640_v31 = vsub.f32 1.0, %v1639_v20 }
0x1239   :  { %v1641_v21 = vmul.f32 %v1888_v19, %v1640_v31 }
0x123b   :  { %v1642_v23 = vadd.f32 %v1888_v19, %v1641_v21 }
0x123d   :  { %v1646_v25 = vsel %vm1645_vm6, %v1888_v19, %v1642_v23 }
0x123e   :  { %v1651_v27 = vsel %vm1648_vm7, %v1650_v4, %v1646_v25 }
0x1262   :  { %v1629_v58 = vpop.xlane.xlu1 %1628 }
0x1263   :  { %v1630_v10 = vrot.slane %v1629_v58, 4 }
0x1265   :  { %v1631_v12 = vadd.f32 %v1630_v10, %v1629_v58 }
0x1267   :  { %v1632_v13 = vrot.slane %v1631_v12, 2 }
0x1269   :  { %v1633_v14 = vadd.f32 %v1632_v13, %v1631_v12 }
0x126b   :  { %v1634_v15 = vrot.slane %v1633_v14, 1 }
0x126d   :  { %v1635_v16 = vadd.f32 %v1634_v15, %v1633_v14 }
0x126f   :  { %1784 = vpush %v1635_v16 }
0x12a0   :  { %s1785_s1 = spop %1784 }
0x12a1   :  { %v1637_v26 = vstv %s1785_s1 }
0x12a2   :  { %v1652_v28 = vmul.f32 %v1651_v27, %v1637_v26 }
0x12a4   :  { %1654 = vst.msk [vmem:[#allocation5] sm:$0x1] %vm1653_vm2, %v1652_v28 }
0x12a5   :  { %1667 = dma.vmem_to_hbm [thread:$0]  %s1663_s18, 16, %s1665_s29, [#allocation6]  }
0x12a6   :  { %1927 = dma.done.wait [#allocation6], 16  }
0x12a7   :  { %1928 = vsyncadd [#allocation6], 4294967280 }
0x12a8   :  { %1674 = vsyncpa [#allocation6], 1 }

</bundles_post_ra>
